<compile_context>
chip_gen: v6e
topology: v6e:2x2x1
jax: 0.10.0
libtpu: 0.0.40
codegen_flags: <defaults>
</compile_context>

<pallas_src>
import jax
import jax.numpy as jnp
from jax import lax
from jax.experimental import pallas as pl
from jax.experimental.pallas import tpu as pltpu


# ----------------------------- Pallas kernel --------------------------------

def _make_generator_kernel(num_layers: int, hidden_size: int, seq_len: int,
                           batch: int, out_size: int):
    L, H, T, B, O = num_layers, hidden_size, seq_len, batch, out_size

    def kernel(*refs):
        # refs = [x, wih0, whh0, b0, (Wfused_l, b_l) for l in 1..L-1,
        #         w_lin, b_lin, out, xproj_scr, hseq_scr]
        x_ref, wih0_ref, whh0_ref, b0_ref = refs[:4]
        deep = refs[4:4 + 2 * (L - 1)]
        wlin_ref = refs[4 + 2 * (L - 1)]
        blin_ref = refs[5 + 2 * (L - 1)]
        out_ref = refs[6 + 2 * (L - 1)]
        xproj_scr = refs[7 + 2 * (L - 1)]   # (T, B, 4H) VMEM
        hseq_scr = refs[8 + 2 * (L - 1)]    # (T, B, H)  VMEM

        f32 = jnp.float32

        # ---- Hoisted layer-0 input projection: one MXU call for all T steps.
        x_all = x_ref[...].reshape(T * B, -1)                      # (T*B, I)
        xproj = (jnp.dot(x_all, wih0_ref[...], preferred_element_type=f32)
                 + b0_ref[...])                                    # (T*B, 4H)
        xproj_scr[...] = xproj.reshape(T, B, 4 * H)

        # Weights loaded once; reused (closed over) in every unrolled step.
        whh0 = whh0_ref[...]                                       # (H, 4H)
        deep_w = [deep[2 * i][...] for i in range(L - 1)]          # (2H, 4H)
        deep_b = [deep[2 * i + 1][...] for i in range(L - 1)]      # (1, 4H)

        def lstm_cell(gates, c_prev):
            # PyTorch gate order: i, f, g, o.
            i_g = jax.nn.sigmoid(gates[:, 0 * H:1 * H])
            f_g = jax.nn.sigmoid(gates[:, 1 * H:2 * H])
            g_g = jnp.tanh(gates[:, 2 * H:3 * H])
            o_g = jax.nn.sigmoid(gates[:, 3 * H:4 * H])
            c_new = f_g * c_prev + i_g * g_g
            h_new = o_g * jnp.tanh(c_new)
            return h_new, c_new

        def body(t, carry):
            hs, cs = carry
            # Layer 0: only the recurrent matmul is on the serial path.
            gates0 = xproj_scr[t] + jnp.dot(hs[0], whh0,
                                            preferred_element_type=f32)
            h0, c0 = lstm_cell(gates0, cs[0])
            new_h, new_c = [h0], [c0]
            inp = h0
            # Deeper layers: single fused matmul per layer-step.
            for l in range(1, L):
                xin = jnp.concatenate([inp, hs[l]], axis=-1)       # (B, 2H)
                gates = (jnp.dot(xin, deep_w[l - 1],
                                 preferred_element_type=f32) + deep_b[l - 1])
                hl, cl = lstm_cell(gates, cs[l])
                new_h.append(hl)
                new_c.append(cl)
                inp = hl
            hseq_scr[t] = inp                                      # last layer h_t
            return tuple(new_h), tuple(new_c)

        h_init = tuple(jnp.zeros((B, H), f32) for _ in range(L))   # init_hidden()
        c_init = tuple(jnp.zeros((B, H), f32) for _ in range(L))
        lax.fori_loop(0, T, body, (h_init, c_init), unroll=True)

        # ---- Hoisted Linear + Tanh head over all timesteps at once.
        h_all = hseq_scr[...].reshape(T * B, H)
        y = jnp.tanh(jnp.dot(h_all, wlin_ref[...],
                             preferred_element_type=f32) + blin_ref[...])
        out_ref[...] = y.reshape(T, B, O)

    return kernel


# ------------------------------- wrapper -------------------------------------

def generator_forward(x, params):
    """x: (T, B, input_size) float32. Returns (T, B, output_size)."""
    T, B, I = x.shape
    layers = params["layers"]            # list of (w_ih (in,4H), w_hh (H,4H), b (1,4H))
    w_lin = params["w_lin"]              # (H, O)
    b_lin = params["b_lin"]              # (1, O)
    L = len(layers)
    H = layers[0][1].shape[0]
    O = w_lin.shape[1]

    # Pad batch to a full sublane group (multiple of 8). Padded rows are
    # independent (batch rows don't interact) and sliced off at the end.
    B_pad = max(8, ((B + 7) // 8) * 8)
    if B_pad != B:
        x_in = jnp.zeros((T, B_pad, I), x.dtype).at[:, :B, :].set(x)
    else:
        x_in = x

    # Host-side one-time weight prep:
    #  - layer 0 kept separate (its input projection is hoisted),
    #  - layers > 0: W_ih / W_hh fused into a single (2H, 4H) matrix.
    w_ih0, w_hh0, b0 = layers[0]
    flat_inputs = [x_in, w_ih0, w_hh0, b0]
    for l in range(1, L):
        w_ih, w_hh, b = layers[l]
        flat_inputs += [jnp.concatenate([w_ih, w_hh], axis=0), b]
    flat_inputs += [w_lin, b_lin]

    kernel = _make_generator_kernel(L, H, T, B_pad, O)
    vmem_spec = lambda: pl.BlockSpec(memory_space=pltpu.MemorySpace.VMEM)

    out = pl.pallas_call(
        kernel,
        out_shape=jax.ShapeDtypeStruct((T, B_pad, O), jnp.float32),
        in_specs=[vmem_spec() for _ in flat_inputs],
        out_specs=vmem_spec(),
        scratch_shapes=[
            pltpu.VMEM((T, B_pad, 4 * H), jnp.float32),  # hoisted layer-0 input proj
            pltpu.VMEM((T, B_pad, H), jnp.float32),      # last-layer h_t for all steps
        ],
    )(*flat_inputs)
    return out[:, :B, :]


# ------------------------- pure-JAX reference -------------------------------

def reference_forward(x, params):
    layers = params["layers"]
    w_lin = params["w_lin"]
    b_lin = params["b_lin"]
    L = len(layers)
    H = layers[0][1].shape[0]
    T, B, _ = x.shape

    def step(carry, x_t):
        h, c = carry
        inp = x_t
        new_h, new_c = [], []
        for l in range(L):
            w_ih, w_hh, b = layers[l]
            gates = inp @ w_ih + h[l] @ w_hh + b[0]
            i_g = jax.nn.sigmoid(gates[:, 0 * H:1 * H])
            f_g = jax.nn.sigmoid(gates[:, 1 * H:2 * H])
            g_g = jnp.tanh(gates[:, 2 * H:3 * H])
            o_g = jax.nn.sigmoid(gates[:, 3 * H:4 * H])
            c_n = f_g * c[l] + i_g * g_g
            h_n = o_g * jnp.tanh(c_n)
            new_h.append(h_n)
            new_c.append(c_n)
            inp = h_n
        out = jnp.tanh(inp @ w_lin + b_lin[0])
        return (jnp.stack(new_h), jnp.stack(new_c)), out

    h0 = jnp.zeros((L, B, H), jnp.float32)
    c0 = jnp.zeros((L, B, H), jnp.float32)
    _, ys = lax.scan(step, (h0, c0), x)
    return ys


# ------------------------------- parameters ---------------------------------

def init_params(key, input_size, hidden_size, num_layers, output_size):
    H = hidden_size
    bound = 1.0 / jnp.sqrt(jnp.float32(H))  # PyTorch LSTM default uniform init
    layers = []
    for l in range(num_layers):
        in_l = input_size if l == 0 else H
        key, k1, k2, k3, k4 = jax.random.split(key, 5)
        # Stored pre-transposed: (in, 4H) / (H, 4H) for direct x @ W matmuls.
        w_ih = jax.random.uniform(k1, (in_l, 4 * H), jnp.float32, -bound, bound)
        w_hh = jax.random.uniform(k2, (H, 4 * H), jnp.float32, -bound, bound)
        b_ih = jax.random.uniform(k3, (1, 4 * H), jnp.float32, -bound, bound)
        b_hh = jax.random.uniform(k4, (1, 4 * H), jnp.float32, -bound, bound)
        layers.append((w_ih, w_hh, b_ih + b_hh))
    key, k5 = jax.random.split(key)
    # _init_weights(): Linear weight ~ N(0, 0.02), bias = 0.
    w_lin = 0.02 * jax.random.normal(k5, (H, output_size), jnp.float32)
    b_lin = jnp.zeros((1, output_size), jnp.float32)
    return {"layers": layers, "w_lin": w_lin, "b_lin": b_lin}


# --------------------------------- main --------------------------------------

if __name__ == "__main__":
    T, B = 8, 4                       # seq_len, batch
    input_size, hidden_size = 16, 32
    num_layers, output_size = 2, 16

    key = jax.random.PRNGKey(0)
    kx, kp = jax.random.split(key)
    x = jax.random.normal(kx, (T, B, input_size), jnp.float32)
    params = init_params(kp, input_size, hidden_size, num_layers, output_size)

    out = generator_forward(x, params)
    out = jax.block_until_ready(out)

    ref = jax.block_until_ready(reference_forward(x, params))
    assert out.shape == (T, B, output_size)
    assert jnp.allclose(out, ref, atol=1e-4, rtol=1e-4), "mismatch vs reference"

    print("KERNEL_OK")
</pallas_src>

<mosaic_0001>
module attributes {stable_mosaic.version = 11 : i64} {
  func.func @kernel(%arg0: memref<8x8x16xf32, #tpu.memory_space<vmem>>, %arg1: memref<16x128xf32, #tpu.memory_space<vmem>>, %arg2: memref<32x128xf32, #tpu.memory_space<vmem>>, %arg3: memref<1x128xf32, #tpu.memory_space<vmem>>, %arg4: memref<64x128xf32, #tpu.memory_space<vmem>>, %arg5: memref<1x128xf32, #tpu.memory_space<vmem>>, %arg6: memref<32x16xf32, #tpu.memory_space<vmem>>, %arg7: memref<1x16xf32, #tpu.memory_space<vmem>>, %arg8: memref<8x8x16xf32, #tpu.memory_space<vmem>>, %arg9: memref<8x8x128xf32, #tpu.memory_space<vmem>>, %arg10: memref<8x8x32xf32, #tpu.memory_space<vmem>>) attributes {dimension_semantics = [], scalar_prefetch = 0 : i64, scratch_operands = 2 : i64, tpu.core_type = #tpu.core_type<tc>} {
    %c0 = arith.constant 0 : index
    %c0_0 = arith.constant 0 : index
    %c0_1 = arith.constant 0 : index
    %0 = vector.load %arg0[%c0, %c0_0, %c0_1] : memref<8x8x16xf32, #tpu.memory_space<vmem>>, vector<8x8x16xf32>
    %1 = vector.shape_cast %0 : vector<8x8x16xf32> to vector<64x16xf32>
    %c0_2 = arith.constant 0 : index
    %c0_3 = arith.constant 0 : index
    %2 = vector.load %arg1[%c0_2, %c0_3] : memref<16x128xf32, #tpu.memory_space<vmem>>, vector<16x128xf32>
    %cst = arith.constant dense<0.000000e+00> : vector<64x128xf32>
    %3 = tpu.matmul %1, %2, %cst {dimension_numbers = #tpu.dot_dimension_numbers<[1], [0], [0], [1], [0, 0, 1, 1], [], []>} : vector<64x16xf32>, vector<16x128xf32>, vector<64x128xf32> -> vector<64x128xf32>
    %c0_4 = arith.constant 0 : index
    %c0_5 = arith.constant 0 : index
    %4 = vector.load %arg3[%c0_4, %c0_5] : memref<1x128xf32, #tpu.memory_space<vmem>>, vector<1x128xf32>
    %5 = vector.broadcast %4 : vector<1x128xf32> to vector<64x128xf32>
    %6 = arith.addf %3, %5 : vector<64x128xf32>
    %7 = vector.shape_cast %6 : vector<64x128xf32> to vector<8x8x128xf32>
    %c0_6 = arith.constant 0 : index
    %c0_7 = arith.constant 0 : index
    %c0_8 = arith.constant 0 : index
    %8 = vector.load %arg9[%c0_6, %c0_7, %c0_8] : memref<8x8x128xf32, #tpu.memory_space<vmem>>, vector<8x8x128xf32>
    tpu.vector_store %arg9[%c0_6, %c0_7, %c0_8], %7 {strides = array<i32>} : memref<8x8x128xf32, #tpu.memory_space<vmem>>, vector<8x8x128xf32>,
    %c0_9 = arith.constant 0 : index
    %c0_10 = arith.constant 0 : index
    %9 = vector.load %arg2[%c0_9, %c0_10] : memref<32x128xf32, #tpu.memory_space<vmem>>, vector<32x128xf32>
    %c0_11 = arith.constant 0 : index
    %c0_12 = arith.constant 0 : index
    %10 = vector.load %arg4[%c0_11, %c0_12] : memref<64x128xf32, #tpu.memory_space<vmem>>, vector<64x128xf32>
    %c0_13 = arith.constant 0 : index
    %c0_14 = arith.constant 0 : index
    %11 = vector.load %arg5[%c0_13, %c0_14] : memref<1x128xf32, #tpu.memory_space<vmem>>, vector<1x128xf32>
    %cst_15 = arith.constant 0.000000e+00 : f32
    %12 = vector.broadcast %cst_15 : f32 to vector<8x32xf32>
    %cst_16 = arith.constant 0.000000e+00 : f32
    %13 = vector.broadcast %cst_16 : f32 to vector<8x32xf32>
    %cst_17 = arith.constant 0.000000e+00 : f32
    %14 = vector.broadcast %cst_17 : f32 to vector<8x32xf32>
    %cst_18 = arith.constant 0.000000e+00 : f32
    %15 = vector.broadcast %cst_18 : f32 to vector<8x32xf32>
    %c0_i32 = arith.constant 0 : i32
    %16 = arith.index_cast %c0_i32 : i32 to index
    %c0_19 = arith.constant 0 : index
    %c0_20 = arith.constant 0 : index
    %17 = vector.load %arg9[%16, %c0_19, %c0_20] : memref<8x8x128xf32, #tpu.memory_space<vmem>>, vector<1x8x128xf32>
    %18 = vector.shape_cast %17 : vector<1x8x128xf32> to vector<8x128xf32>
    %cst_21 = arith.constant dense<0.000000e+00> : vector<8x128xf32>
    %19 = tpu.matmul %12, %9, %cst_21 {dimension_numbers = #tpu.dot_dimension_numbers<[1], [0], [0], [1], [0, 0, 1, 1], [], []>} : vector<8x32xf32>, vector<32x128xf32>, vector<8x128xf32> -> vector<8x128xf32>
    %20 = arith.addf %18, %19 : vector<8x128xf32>
    %21 = vector.extract_strided_slice %20 {offsets = [0, 0], sizes = [8, 32], strides = [1, 1]} : vector<8x128xf32> to vector<8x32xf32>
    %22 = arith.negf %21 : vector<8x32xf32>
    %23 = math.exp %22 : vector<8x32xf32>
    %cst_22 = arith.constant 1.000000e+00 : f32
    %24 = vector.broadcast %cst_22 : f32 to vector<8x32xf32>
    %25 = arith.addf %24, %23 : vector<8x32xf32>
    %26 = arith.divf %24, %25 : vector<8x32xf32>
    %27 = vector.extract_strided_slice %20 {offsets = [0, 32], sizes = [8, 32], strides = [1, 1]} : vector<8x128xf32> to vector<8x32xf32>
    %28 = arith.negf %27 : vector<8x32xf32>
    %29 = math.exp %28 : vector<8x32xf32>
    %cst_23 = arith.constant 1.000000e+00 : f32
    %30 = vector.broadcast %cst_23 : f32 to vector<8x32xf32>
    %31 = arith.addf %30, %29 : vector<8x32xf32>
    %32 = arith.divf %30, %31 : vector<8x32xf32>
    %33 = vector.extract_strided_slice %20 {offsets = [0, 64], sizes = [8, 32], strides = [1, 1]} : vector<8x128xf32> to vector<8x32xf32>
    %34 = math.tanh %33 : vector<8x32xf32>
    %35 = vector.extract_strided_slice %20 {offsets = [0, 96], sizes = [8, 32], strides = [1, 1]} : vector<8x128xf32> to vector<8x32xf32>
    %36 = arith.negf %35 : vector<8x32xf32>
    %37 = math.exp %36 : vector<8x32xf32>
    %cst_24 = arith.constant 1.000000e+00 : f32
    %38 = vector.broadcast %cst_24 : f32 to vector<8x32xf32>
    %39 = arith.addf %38, %37 : vector<8x32xf32>
    %40 = arith.divf %38, %39 : vector<8x32xf32>
    %41 = arith.mulf %32, %14 : vector<8x32xf32>
    %42 = arith.mulf %26, %34 : vector<8x32xf32>
    %43 = arith.addf %41, %42 : vector<8x32xf32>
    %44 = math.tanh %43 : vector<8x32xf32>
    %45 = arith.mulf %40, %44 : vector<8x32xf32>
    %46 = tpu.concatenate %45, %13 in 1 : vector<8x32xf32>, vector<8x32xf32> -> vector<8x64xf32>
    %cst_25 = arith.constant dense<0.000000e+00> : vector<8x128xf32>
    %47 = tpu.matmul %46, %10, %cst_25 {dimension_numbers = #tpu.dot_dimension_numbers<[1], [0], [0], [1], [0, 0, 1, 1], [], []>} : vector<8x64xf32>, vector<64x128xf32>, vector<8x128xf32> -> vector<8x128xf32>
    %48 = vector.broadcast %11 : vector<1x128xf32> to vector<8x128xf32>
    %49 = arith.addf %47, %48 : vector<8x128xf32>
    %50 = vector.extract_strided_slice %49 {offsets = [0, 0], sizes = [8, 32], strides = [1, 1]} : vector<8x128xf32> to vector<8x32xf32>
    %51 = arith.negf %50 : vector<8x32xf32>
    %52 = math.exp %51 : vector<8x32xf32>
    %cst_26 = arith.constant 1.000000e+00 : f32
    %53 = vector.broadcast %cst_26 : f32 to vector<8x32xf32>
    %54 = arith.addf %53, %52 : vector<8x32xf32>
    %55 = arith.divf %53, %54 : vector<8x32xf32>
    %56 = vector.extract_strided_slice %49 {offsets = [0, 32], sizes = [8, 32], strides = [1, 1]} : vector<8x128xf32> to vector<8x32xf32>
    %57 = arith.negf %56 : vector<8x32xf32>
    %58 = math.exp %57 : vector<8x32xf32>
    %cst_27 = arith.constant 1.000000e+00 : f32
    %59 = vector.broadcast %cst_27 : f32 to vector<8x32xf32>
    %60 = arith.addf %59, %58 : vector<8x32xf32>
    %61 = arith.divf %59, %60 : vector<8x32xf32>
    %62 = vector.extract_strided_slice %49 {offsets = [0, 64], sizes = [8, 32], strides = [1, 1]} : vector<8x128xf32> to vector<8x32xf32>
    %63 = math.tanh %62 : vector<8x32xf32>
    %64 = vector.extract_strided_slice %49 {offsets = [0, 96], sizes = [8, 32], strides = [1, 1]} : vector<8x128xf32> to vector<8x32xf32>
    %65 = arith.negf %64 : vector<8x32xf32>
    %66 = math.exp %65 : vector<8x32xf32>
    %cst_28 = arith.constant 1.000000e+00 : f32
    %67 = vector.broadcast %cst_28 : f32 to vector<8x32xf32>
    %68 = arith.addf %67, %66 : vector<8x32xf32>
    %69 = arith.divf %67, %68 : vector<8x32xf32>
    %70 = arith.mulf %61, %15 : vector<8x32xf32>
    %71 = arith.mulf %55, %63 : vector<8x32xf32>
    %72 = arith.addf %70, %71 : vector<8x32xf32>
    %73 = math.tanh %72 : vector<8x32xf32>
    %74 = arith.mulf %69, %73 : vector<8x32xf32>
    %75 = arith.index_cast %c0_i32 : i32 to index
    %c0_29 = arith.constant 0 : index
    %c0_30 = arith.constant 0 : index
    %76 = vector.load %arg10[%75, %c0_29, %c0_30] : memref<8x8x32xf32, #tpu.memory_space<vmem>>, vector<1x8x32xf32>
    %77 = vector.shape_cast %76 : vector<1x8x32xf32> to vector<8x32xf32>
    %78 = vector.shape_cast %74 : vector<8x32xf32> to vector<1x8x32xf32>
    tpu.vector_store %arg10[%75, %c0_29, %c0_30], %78 {strides = array<i32>} : memref<8x8x32xf32, #tpu.memory_space<vmem>>, vector<1x8x32xf32>,
    %c1_i32 = arith.constant 1 : i32
    %79 = arith.index_cast %c1_i32 : i32 to index
    %c0_31 = arith.constant 0 : index
    %c0_32 = arith.constant 0 : index
    %80 = vector.load %arg9[%79, %c0_31, %c0_32] : memref<8x8x128xf32, #tpu.memory_space<vmem>>, vector<1x8x128xf32>
    %81 = vector.shape_cast %80 : vector<1x8x128xf32> to vector<8x128xf32>
    %cst_33 = arith.constant dense<0.000000e+00> : vector<8x128xf32>
    %82 = tpu.matmul %45, %9, %cst_33 {dimension_numbers = #tpu.dot_dimension_numbers<[1], [0], [0], [1], [0, 0, 1, 1], [], []>} : vector<8x32xf32>, vector<32x128xf32>, vector<8x128xf32> -> vector<8x128xf32>
    %83 = arith.addf %81, %82 : vector<8x128xf32>
    %84 = vector.extract_strided_slice %83 {offsets = [0, 0], sizes = [8, 32], strides = [1, 1]} : vector<8x128xf32> to vector<8x32xf32>
    %85 = arith.negf %84 : vector<8x32xf32>
    %86 = math.exp %85 : vector<8x32xf32>
    %cst_34 = arith.constant 1.000000e+00 : f32
    %87 = vector.broadcast %cst_34 : f32 to vector<8x32xf32>
    %88 = arith.addf %87, %86 : vector<8x32xf32>
    %89 = arith.divf %87, %88 : vector<8x32xf32>
    %90 = vector.extract_strided_slice %83 {offsets = [0, 32], sizes = [8, 32], strides = [1, 1]} : vector<8x128xf32> to vector<8x32xf32>
    %91 = arith.negf %90 : vector<8x32xf32>
    %92 = math.exp %91 : vector<8x32xf32>
    %cst_35 = arith.constant 1.000000e+00 : f32
    %93 = vector.broadcast %cst_35 : f32 to vector<8x32xf32>
    %94 = arith.addf %93, %92 : vector<8x32xf32>
    %95 = arith.divf %93, %94 : vector<8x32xf32>
    %96 = vector.extract_strided_slice %83 {offsets = [0, 64], sizes = [8, 32], strides = [1, 1]} : vector<8x128xf32> to vector<8x32xf32>
    %97 = math.tanh %96 : vector<8x32xf32>
    %98 = vector.extract_strided_slice %83 {offsets = [0, 96], sizes = [8, 32], strides = [1, 1]} : vector<8x128xf32> to vector<8x32xf32>
    %99 = arith.negf %98 : vector<8x32xf32>
    %100 = math.exp %99 : vector<8x32xf32>
    %cst_36 = arith.constant 1.000000e+00 : f32
    %101 = vector.broadcast %cst_36 : f32 to vector<8x32xf32>
    %102 = arith.addf %101, %100 : vector<8x32xf32>
    %103 = arith.divf %101, %102 : vector<8x32xf32>
    %104 = arith.mulf %95, %43 : vector<8x32xf32>
    %105 = arith.mulf %89, %97 : vector<8x32xf32>
    %106 = arith.addf %104, %105 : vector<8x32xf32>
    %107 = math.tanh %106 : vector<8x32xf32>
    %108 = arith.mulf %103, %107 : vector<8x32xf32>
    %109 = tpu.concatenate %108, %74 in 1 : vector<8x32xf32>, vector<8x32xf32> -> vector<8x64xf32>
    %cst_37 = arith.constant dense<0.000000e+00> : vector<8x128xf32>
    %110 = tpu.matmul %109, %10, %cst_37 {dimension_numbers = #tpu.dot_dimension_numbers<[1], [0], [0], [1], [0, 0, 1, 1], [], []>} : vector<8x64xf32>, vector<64x128xf32>, vector<8x128xf32> -> vector<8x128xf32>
    %111 = vector.broadcast %11 : vector<1x128xf32> to vector<8x128xf32>
    %112 = arith.addf %110, %111 : vector<8x128xf32>
    %113 = vector.extract_strided_slice %112 {offsets = [0, 0], sizes = [8, 32], strides = [1, 1]} : vector<8x128xf32> to vector<8x32xf32>
    %114 = arith.negf %113 : vector<8x32xf32>
    %115 = math.exp %114 : vector<8x32xf32>
    %cst_38 = arith.constant 1.000000e+00 : f32
    %116 = vector.broadcast %cst_38 : f32 to vector<8x32xf32>
    %117 = arith.addf %116, %115 : vector<8x32xf32>
    %118 = arith.divf %116, %117 : vector<8x32xf32>
    %119 = vector.extract_strided_slice %112 {offsets = [0, 32], sizes = [8, 32], strides = [1, 1]} : vector<8x128xf32> to vector<8x32xf32>
    %120 = arith.negf %119 : vector<8x32xf32>
    %121 = math.exp %120 : vector<8x32xf32>
    %cst_39 = arith.constant 1.000000e+00 : f32
    %122 = vector.broadcast %cst_39 : f32 to vector<8x32xf32>
    %123 = arith.addf %122, %121 : vector<8x32xf32>
    %124 = arith.divf %122, %123 : vector<8x32xf32>
    %125 = vector.extract_strided_slice %112 {offsets = [0, 64], sizes = [8, 32], strides = [1, 1]} : vector<8x128xf32> to vector<8x32xf32>
    %126 = math.tanh %125 : vector<8x32xf32>
    %127 = vector.extract_strided_slice %112 {offsets = [0, 96], sizes = [8, 32], strides = [1, 1]} : vector<8x128xf32> to vector<8x32xf32>
    %128 = arith.negf %127 : vector<8x32xf32>
    %129 = math.exp %128 : vector<8x32xf32>
    %cst_40 = arith.constant 1.000000e+00 : f32
    %130 = vector.broadcast %cst_40 : f32 to vector<8x32xf32>
    %131 = arith.addf %130, %129 : vector<8x32xf32>
    %132 = arith.divf %130, %131 : vector<8x32xf32>
    %133 = arith.mulf %124, %72 : vector<8x32xf32>
    %134 = arith.mulf %118, %126 : vector<8x32xf32>
    %135 = arith.addf %133, %134 : vector<8x32xf32>
    %136 = math.tanh %135 : vector<8x32xf32>
    %137 = arith.mulf %132, %136 : vector<8x32xf32>
    %138 = arith.index_cast %c1_i32 : i32 to index
    %c0_41 = arith.constant 0 : index
    %c0_42 = arith.constant 0 : index
    %139 = vector.load %arg10[%138, %c0_41, %c0_42] : memref<8x8x32xf32, #tpu.memory_space<vmem>>, vector<1x8x32xf32>
    %140 = vector.shape_cast %139 : vector<1x8x32xf32> to vector<8x32xf32>
    %141 = vector.shape_cast %137 : vector<8x32xf32> to vector<1x8x32xf32>
    tpu.vector_store %arg10[%138, %c0_41, %c0_42], %141 {strides = array<i32>} : memref<8x8x32xf32, #tpu.memory_space<vmem>>, vector<1x8x32xf32>,
    %c2_i32 = arith.constant 2 : i32
    %142 = arith.index_cast %c2_i32 : i32 to index
    %c0_43 = arith.constant 0 : index
    %c0_44 = arith.constant 0 : index
    %143 = vector.load %arg9[%142, %c0_43, %c0_44] : memref<8x8x128xf32, #tpu.memory_space<vmem>>, vector<1x8x128xf32>
    %144 = vector.shape_cast %143 : vector<1x8x128xf32> to vector<8x128xf32>
    %cst_45 = arith.constant dense<0.000000e+00> : vector<8x128xf32>
    %145 = tpu.matmul %108, %9, %cst_45 {dimension_numbers = #tpu.dot_dimension_numbers<[1], [0], [0], [1], [0, 0, 1, 1], [], []>} : vector<8x32xf32>, vector<32x128xf32>, vector<8x128xf32> -> vector<8x128xf32>
    %146 = arith.addf %144, %145 : vector<8x128xf32>
    %147 = vector.extract_strided_slice %146 {offsets = [0, 0], sizes = [8, 32], strides = [1, 1]} : vector<8x128xf32> to vector<8x32xf32>
    %148 = arith.negf %147 : vector<8x32xf32>
    %149 = math.exp %148 : vector<8x32xf32>
    %cst_46 = arith.constant 1.000000e+00 : f32
    %150 = vector.broadcast %cst_46 : f32 to vector<8x32xf32>
    %151 = arith.addf %150, %149 : vector<8x32xf32>
    %152 = arith.divf %150, %151 : vector<8x32xf32>
    %153 = vector.extract_strided_slice %146 {offsets = [0, 32], sizes = [8, 32], strides = [1, 1]} : vector<8x128xf32> to vector<8x32xf32>
    %154 = arith.negf %153 : vector<8x32xf32>
    %155 = math.exp %154 : vector<8x32xf32>
    %cst_47 = arith.constant 1.000000e+00 : f32
    %156 = vector.broadcast %cst_47 : f32 to vector<8x32xf32>
    %157 = arith.addf %156, %155 : vector<8x32xf32>
    %158 = arith.divf %156, %157 : vector<8x32xf32>
    %159 = vector.extract_strided_slice %146 {offsets = [0, 64], sizes = [8, 32], strides = [1, 1]} : vector<8x128xf32> to vector<8x32xf32>
    %160 = math.tanh %159 : vector<8x32xf32>
    %161 = vector.extract_strided_slice %146 {offsets = [0, 96], sizes = [8, 32], strides = [1, 1]} : vector<8x128xf32> to vector<8x32xf32>
    %162 = arith.negf %161 : vector<8x32xf32>
    %163 = math.exp %162 : vector<8x32xf32>
    %cst_48 = arith.constant 1.000000e+00 : f32
    %164 = vector.broadcast %cst_48 : f32 to vector<8x32xf32>
    %165 = arith.addf %164, %163 : vector<8x32xf32>
    %166 = arith.divf %164, %165 : vector<8x32xf32>
    %167 = arith.mulf %158, %106 : vector<8x32xf32>
    %168 = arith.mulf %152, %160 : vector<8x32xf32>
    %169 = arith.addf %167, %168 : vector<8x32xf32>
    %170 = math.tanh %169 : vector<8x32xf32>
    %171 = arith.mulf %166, %170 : vector<8x32xf32>
    %172 = tpu.concatenate %171, %137 in 1 : vector<8x32xf32>, vector<8x32xf32> -> vector<8x64xf32>
    %cst_49 = arith.constant dense<0.000000e+00> : vector<8x128xf32>
    %173 = tpu.matmul %172, %10, %cst_49 {dimension_numbers = #tpu.dot_dimension_numbers<[1], [0], [0], [1], [0, 0, 1, 1], [], []>} : vector<8x64xf32>, vector<64x128xf32>, vector<8x128xf32> -> vector<8x128xf32>
    %174 = vector.broadcast %11 : vector<1x128xf32> to vector<8x128xf32>
    %175 = arith.addf %173, %174 : vector<8x128xf32>
    %176 = vector.extract_strided_slice %175 {offsets = [0, 0], sizes = [8, 32], strides = [1, 1]} : vector<8x128xf32> to vector<8x32xf32>
    %177 = arith.negf %176 : vector<8x32xf32>
    %178 = math.exp %177 : vector<8x32xf32>
    %cst_50 = arith.constant 1.000000e+00 : f32
    %179 = vector.broadcast %cst_50 : f32 to vector<8x32xf32>
    %180 = arith.addf %179, %178 : vector<8x32xf32>
    %181 = arith.divf %179, %180 : vector<8x32xf32>
    %182 = vector.extract_strided_slice %175 {offsets = [0, 32], sizes = [8, 32], strides = [1, 1]} : vector<8x128xf32> to vector<8x32xf32>
    %183 = arith.negf %182 : vector<8x32xf32>
    %184 = math.exp %183 : vector<8x32xf32>
    %cst_51 = arith.constant 1.000000e+00 : f32
    %185 = vector.broadcast %cst_51 : f32 to vector<8x32xf32>
    %186 = arith.addf %185, %184 : vector<8x32xf32>
    %187 = arith.divf %185, %186 : vector<8x32xf32>
    %188 = vector.extract_strided_slice %175 {offsets = [0, 64], sizes = [8, 32], strides = [1, 1]} : vector<8x128xf32> to vector<8x32xf32>
    %189 = math.tanh %188 : vector<8x32xf32>
    %190 = vector.extract_strided_slice %175 {offsets = [0, 96], sizes = [8, 32], strides = [1, 1]} : vector<8x128xf32> to vector<8x32xf32>
    %191 = arith.negf %190 : vector<8x32xf32>
    %192 = math.exp %191 : vector<8x32xf32>
    %cst_52 = arith.constant 1.000000e+00 : f32
    %193 = vector.broadcast %cst_52 : f32 to vector<8x32xf32>
    %194 = arith.addf %193, %192 : vector<8x32xf32>
    %195 = arith.divf %193, %194 : vector<8x32xf32>
    %196 = arith.mulf %187, %135 : vector<8x32xf32>
    %197 = arith.mulf %181, %189 : vector<8x32xf32>
    %198 = arith.addf %196, %197 : vector<8x32xf32>
    %199 = math.tanh %198 : vector<8x32xf32>
    %200 = arith.mulf %195, %199 : vector<8x32xf32>
    %201 = arith.index_cast %c2_i32 : i32 to index
    %c0_53 = arith.constant 0 : index
    %c0_54 = arith.constant 0 : index
    %202 = vector.load %arg10[%201, %c0_53, %c0_54] : memref<8x8x32xf32, #tpu.memory_space<vmem>>, vector<1x8x32xf32>
    %203 = vector.shape_cast %202 : vector<1x8x32xf32> to vector<8x32xf32>
    %204 = vector.shape_cast %200 : vector<8x32xf32> to vector<1x8x32xf32>
    tpu.vector_store %arg10[%201, %c0_53, %c0_54], %204 {strides = array<i32>} : memref<8x8x32xf32, #tpu.memory_space<vmem>>, vector<1x8x32xf32>,
    %c3_i32 = arith.constant 3 : i32
    %205 = arith.index_cast %c3_i32 : i32 to index
    %c0_55 = arith.constant 0 : index
    %c0_56 = arith.constant 0 : index
    %206 = vector.load %arg9[%205, %c0_55, %c0_56] : memref<8x8x128xf32, #tpu.memory_space<vmem>>, vector<1x8x128xf32>
    %207 = vector.shape_cast %206 : vector<1x8x128xf32> to vector<8x128xf32>
    %cst_57 = arith.constant dense<0.000000e+00> : vector<8x128xf32>
    %208 = tpu.matmul %171, %9, %cst_57 {dimension_numbers = #tpu.dot_dimension_numbers<[1], [0], [0], [1], [0, 0, 1, 1], [], []>} : vector<8x32xf32>, vector<32x128xf32>, vector<8x128xf32> -> vector<8x128xf32>
    %209 = arith.addf %207, %208 : vector<8x128xf32>
    %210 = vector.extract_strided_slice %209 {offsets = [0, 0], sizes = [8, 32], strides = [1, 1]} : vector<8x128xf32> to vector<8x32xf32>
    %211 = arith.negf %210 : vector<8x32xf32>
    %212 = math.exp %211 : vector<8x32xf32>
    %cst_58 = arith.constant 1.000000e+00 : f32
    %213 = vector.broadcast %cst_58 : f32 to vector<8x32xf32>
    %214 = arith.addf %213, %212 : vector<8x32xf32>
    %215 = arith.divf %213, %214 : vector<8x32xf32>
    %216 = vector.extract_strided_slice %209 {offsets = [0, 32], sizes = [8, 32], strides = [1, 1]} : vector<8x128xf32> to vector<8x32xf32>
    %217 = arith.negf %216 : vector<8x32xf32>
    %218 = math.exp %217 : vector<8x32xf32>
    %cst_59 = arith.constant 1.000000e+00 : f32
    %219 = vector.broadcast %cst_59 : f32 to vector<8x32xf32>
    %220 = arith.addf %219, %218 : vector<8x32xf32>
    %221 = arith.divf %219, %220 : vector<8x32xf32>
    %222 = vector.extract_strided_slice %209 {offsets = [0, 64], sizes = [8, 32], strides = [1, 1]} : vector<8x128xf32> to vector<8x32xf32>
    %223 = math.tanh %222 : vector<8x32xf32>
    %224 = vector.extract_strided_slice %209 {offsets = [0, 96], sizes = [8, 32], strides = [1, 1]} : vector<8x128xf32> to vector<8x32xf32>
    %225 = arith.negf %224 : vector<8x32xf32>
    %226 = math.exp %225 : vector<8x32xf32>
    %cst_60 = arith.constant 1.000000e+00 : f32
    %227 = vector.broadcast %cst_60 : f32 to vector<8x32xf32>
    %228 = arith.addf %227, %226 : vector<8x32xf32>
    %229 = arith.divf %227, %228 : vector<8x32xf32>
    %230 = arith.mulf %221, %169 : vector<8x32xf32>
    %231 = arith.mulf %215, %223 : vector<8x32xf32>
    %232 = arith.addf %230, %231 : vector<8x32xf32>
    %233 = math.tanh %232 : vector<8x32xf32>
    %234 = arith.mulf %229, %233 : vector<8x32xf32>
    %235 = tpu.concatenate %234, %200 in 1 : vector<8x32xf32>, vector<8x32xf32> -> vector<8x64xf32>
    %cst_61 = arith.constant dense<0.000000e+00> : vector<8x128xf32>
    %236 = tpu.matmul %235, %10, %cst_61 {dimension_numbers = #tpu.dot_dimension_numbers<[1], [0], [0], [1], [0, 0, 1, 1], [], []>} : vector<8x64xf32>, vector<64x128xf32>, vector<8x128xf32> -> vector<8x128xf32>
    %237 = vector.broadcast %11 : vector<1x128xf32> to vector<8x128xf32>
    %238 = arith.addf %236, %237 : vector<8x128xf32>
    %239 = vector.extract_strided_slice %238 {offsets = [0, 0], sizes = [8, 32], strides = [1, 1]} : vector<8x128xf32> to vector<8x32xf32>
    %240 = arith.negf %239 : vector<8x32xf32>
    %241 = math.exp %240 : vector<8x32xf32>
    %cst_62 = arith.constant 1.000000e+00 : f32
    %242 = vector.broadcast %cst_62 : f32 to vector<8x32xf32>
    %243 = arith.addf %242, %241 : vector<8x32xf32>
    %244 = arith.divf %242, %243 : vector<8x32xf32>
    %245 = vector.extract_strided_slice %238 {offsets = [0, 32], sizes = [8, 32], strides = [1, 1]} : vector<8x128xf32> to vector<8x32xf32>
    %246 = arith.negf %245 : vector<8x32xf32>
    %247 = math.exp %246 : vector<8x32xf32>
    %cst_63 = arith.constant 1.000000e+00 : f32
    %248 = vector.broadcast %cst_63 : f32 to vector<8x32xf32>
    %249 = arith.addf %248, %247 : vector<8x32xf32>
    %250 = arith.divf %248, %249 : vector<8x32xf32>
    %251 = vector.extract_strided_slice %238 {offsets = [0, 64], sizes = [8, 32], strides = [1, 1]} : vector<8x128xf32> to vector<8x32xf32>
    %252 = math.tanh %251 : vector<8x32xf32>
    %253 = vector.extract_strided_slice %238 {offsets = [0, 96], sizes = [8, 32], strides = [1, 1]} : vector<8x128xf32> to vector<8x32xf32>
    %254 = arith.negf %253 : vector<8x32xf32>
    %255 = math.exp %254 : vector<8x32xf32>
    %cst_64 = arith.constant 1.000000e+00 : f32
    %256 = vector.broadcast %cst_64 : f32 to vector<8x32xf32>
    %257 = arith.addf %256, %255 : vector<8x32xf32>
    %258 = arith.divf %256, %257 : vector<8x32xf32>
    %259 = arith.mulf %250, %198 : vector<8x32xf32>
    %260 = arith.mulf %244, %252 : vector<8x32xf32>
    %261 = arith.addf %259, %260 : vector<8x32xf32>
    %262 = math.tanh %261 : vector<8x32xf32>
    %263 = arith.mulf %258, %262 : vector<8x32xf32>
    %264 = arith.index_cast %c3_i32 : i32 to index
    %c0_65 = arith.constant 0 : index
    %c0_66 = arith.constant 0 : index
    %265 = vector.load %arg10[%264, %c0_65, %c0_66] : memref<8x8x32xf32, #tpu.memory_space<vmem>>, vector<1x8x32xf32>
    %266 = vector.shape_cast %265 : vector<1x8x32xf32> to vector<8x32xf32>
    %267 = vector.shape_cast %263 : vector<8x32xf32> to vector<1x8x32xf32>
    tpu.vector_store %arg10[%264, %c0_65, %c0_66], %267 {strides = array<i32>} : memref<8x8x32xf32, #tpu.memory_space<vmem>>, vector<1x8x32xf32>,
    %c4_i32 = arith.constant 4 : i32
    %268 = arith.index_cast %c4_i32 : i32 to index
    %c0_67 = arith.constant 0 : index
    %c0_68 = arith.constant 0 : index
    %269 = vector.load %arg9[%268, %c0_67, %c0_68] : memref<8x8x128xf32, #tpu.memory_space<vmem>>, vector<1x8x128xf32>
    %270 = vector.shape_cast %269 : vector<1x8x128xf32> to vector<8x128xf32>
    %cst_69 = arith.constant dense<0.000000e+00> : vector<8x128xf32>
    %271 = tpu.matmul %234, %9, %cst_69 {dimension_numbers = #tpu.dot_dimension_numbers<[1], [0], [0], [1], [0, 0, 1, 1], [], []>} : vector<8x32xf32>, vector<32x128xf32>, vector<8x128xf32> -> vector<8x128xf32>
    %272 = arith.addf %270, %271 : vector<8x128xf32>
    %273 = vector.extract_strided_slice %272 {offsets = [0, 0], sizes = [8, 32], strides = [1, 1]} : vector<8x128xf32> to vector<8x32xf32>
    %274 = arith.negf %273 : vector<8x32xf32>
    %275 = math.exp %274 : vector<8x32xf32>
    %cst_70 = arith.constant 1.000000e+00 : f32
    %276 = vector.broadcast %cst_70 : f32 to vector<8x32xf32>
    %277 = arith.addf %276, %275 : vector<8x32xf32>
    %278 = arith.divf %276, %277 : vector<8x32xf32>
    %279 = vector.extract_strided_slice %272 {offsets = [0, 32], sizes = [8, 32], strides = [1, 1]} : vector<8x128xf32> to vector<8x32xf32>
    %280 = arith.negf %279 : vector<8x32xf32>
    %281 = math.exp %280 : vector<8x32xf32>
    %cst_71 = arith.constant 1.000000e+00 : f32
    %282 = vector.broadcast %cst_71 : f32 to vector<8x32xf32>
    %283 = arith.addf %282, %281 : vector<8x32xf32>
    %284 = arith.divf %282, %283 : vector<8x32xf32>
    %285 = vector.extract_strided_slice %272 {offsets = [0, 64], sizes = [8, 32], strides = [1, 1]} : vector<8x128xf32> to vector<8x32xf32>
    %286 = math.tanh %285 : vector<8x32xf32>
    %287 = vector.extract_strided_slice %272 {offsets = [0, 96], sizes = [8, 32], strides = [1, 1]} : vector<8x128xf32> to vector<8x32xf32>
    %288 = arith.negf %287 : vector<8x32xf32>
    %289 = math.exp %288 : vector<8x32xf32>
    %cst_72 = arith.constant 1.000000e+00 : f32
    %290 = vector.broadcast %cst_72 : f32 to vector<8x32xf32>
    %291 = arith.addf %290, %289 : vector<8x32xf32>
    %292 = arith.divf %290, %291 : vector<8x32xf32>
    %293 = arith.mulf %284, %232 : vector<8x32xf32>
    %294 = arith.mulf %278, %286 : vector<8x32xf32>
    %295 = arith.addf %293, %294 : vector<8x32xf32>
    %296 = math.tanh %295 : vector<8x32xf32>
    %297 = arith.mulf %292, %296 : vector<8x32xf32>
    %298 = tpu.concatenate %297, %263 in 1 : vector<8x32xf32>, vector<8x32xf32> -> vector<8x64xf32>
    %cst_73 = arith.constant dense<0.000000e+00> : vector<8x128xf32>
    %299 = tpu.matmul %298, %10, %cst_73 {dimension_numbers = #tpu.dot_dimension_numbers<[1], [0], [0], [1], [0, 0, 1, 1], [], []>} : vector<8x64xf32>, vector<64x128xf32>, vector<8x128xf32> -> vector<8x128xf32>
    %300 = vector.broadcast %11 : vector<1x128xf32> to vector<8x128xf32>
    %301 = arith.addf %299, %300 : vector<8x128xf32>
    %302 = vector.extract_strided_slice %301 {offsets = [0, 0], sizes = [8, 32], strides = [1, 1]} : vector<8x128xf32> to vector<8x32xf32>
    %303 = arith.negf %302 : vector<8x32xf32>
    %304 = math.exp %303 : vector<8x32xf32>
    %cst_74 = arith.constant 1.000000e+00 : f32
    %305 = vector.broadcast %cst_74 : f32 to vector<8x32xf32>
    %306 = arith.addf %305, %304 : vector<8x32xf32>
    %307 = arith.divf %305, %306 : vector<8x32xf32>
    %308 = vector.extract_strided_slice %301 {offsets = [0, 32], sizes = [8, 32], strides = [1, 1]} : vector<8x128xf32> to vector<8x32xf32>
    %309 = arith.negf %308 : vector<8x32xf32>
    %310 = math.exp %309 : vector<8x32xf32>
    %cst_75 = arith.constant 1.000000e+00 : f32
    %311 = vector.broadcast %cst_75 : f32 to vector<8x32xf32>
    %312 = arith.addf %311, %310 : vector<8x32xf32>
    %313 = arith.divf %311, %312 : vector<8x32xf32>
    %314 = vector.extract_strided_slice %301 {offsets = [0, 64], sizes = [8, 32], strides = [1, 1]} : vector<8x128xf32> to vector<8x32xf32>
    %315 = math.tanh %314 : vector<8x32xf32>
    %316 = vector.extract_strided_slice %301 {offsets = [0, 96], sizes = [8, 32], strides = [1, 1]} : vector<8x128xf32> to vector<8x32xf32>
    %317 = arith.negf %316 : vector<8x32xf32>
    %318 = math.exp %317 : vector<8x32xf32>
    %cst_76 = arith.constant 1.000000e+00 : f32
    %319 = vector.broadcast %cst_76 : f32 to vector<8x32xf32>
    %320 = arith.addf %319, %318 : vector<8x32xf32>
    %321 = arith.divf %319, %320 : vector<8x32xf32>
    %322 = arith.mulf %313, %261 : vector<8x32xf32>
    %323 = arith.mulf %307, %315 : vector<8x32xf32>
    %324 = arith.addf %322, %323 : vector<8x32xf32>
    %325 = math.tanh %324 : vector<8x32xf32>
    %326 = arith.mulf %321, %325 : vector<8x32xf32>
    %327 = arith.index_cast %c4_i32 : i32 to index
    %c0_77 = arith.constant 0 : index
    %c0_78 = arith.constant 0 : index
    %328 = vector.load %arg10[%327, %c0_77, %c0_78] : memref<8x8x32xf32, #tpu.memory_space<vmem>>, vector<1x8x32xf32>
    %329 = vector.shape_cast %328 : vector<1x8x32xf32> to vector<8x32xf32>
    %330 = vector.shape_cast %326 : vector<8x32xf32> to vector<1x8x32xf32>
    tpu.vector_store %arg10[%327, %c0_77, %c0_78], %330 {strides = array<i32>} : memref<8x8x32xf32, #tpu.memory_space<vmem>>, vector<1x8x32xf32>,
    %c5_i32 = arith.constant 5 : i32
    %331 = arith.index_cast %c5_i32 : i32 to index
    %c0_79 = arith.constant 0 : index
    %c0_80 = arith.constant 0 : index
    %332 = vector.load %arg9[%331, %c0_79, %c0_80] : memref<8x8x128xf32, #tpu.memory_space<vmem>>, vector<1x8x128xf32>
    %333 = vector.shape_cast %332 : vector<1x8x128xf32> to vector<8x128xf32>
    %cst_81 = arith.constant dense<0.000000e+00> : vector<8x128xf32>
    %334 = tpu.matmul %297, %9, %cst_81 {dimension_numbers = #tpu.dot_dimension_numbers<[1], [0], [0], [1], [0, 0, 1, 1], [], []>} : vector<8x32xf32>, vector<32x128xf32>, vector<8x128xf32> -> vector<8x128xf32>
    %335 = arith.addf %333, %334 : vector<8x128xf32>
    %336 = vector.extract_strided_slice %335 {offsets = [0, 0], sizes = [8, 32], strides = [1, 1]} : vector<8x128xf32> to vector<8x32xf32>
    %337 = arith.negf %336 : vector<8x32xf32>
    %338 = math.exp %337 : vector<8x32xf32>
    %cst_82 = arith.constant 1.000000e+00 : f32
    %339 = vector.broadcast %cst_82 : f32 to vector<8x32xf32>
    %340 = arith.addf %339, %338 : vector<8x32xf32>
    %341 = arith.divf %339, %340 : vector<8x32xf32>
    %342 = vector.extract_strided_slice %335 {offsets = [0, 32], sizes = [8, 32], strides = [1, 1]} : vector<8x128xf32> to vector<8x32xf32>
    %343 = arith.negf %342 : vector<8x32xf32>
    %344 = math.exp %343 : vector<8x32xf32>
    %cst_83 = arith.constant 1.000000e+00 : f32
    %345 = vector.broadcast %cst_83 : f32 to vector<8x32xf32>
    %346 = arith.addf %345, %344 : vector<8x32xf32>
    %347 = arith.divf %345, %346 : vector<8x32xf32>
    %348 = vector.extract_strided_slice %335 {offsets = [0, 64], sizes = [8, 32], strides = [1, 1]} : vector<8x128xf32> to vector<8x32xf32>
    %349 = math.tanh %348 : vector<8x32xf32>
    %350 = vector.extract_strided_slice %335 {offsets = [0, 96], sizes = [8, 32], strides = [1, 1]} : vector<8x128xf32> to vector<8x32xf32>
    %351 = arith.negf %350 : vector<8x32xf32>
    %352 = math.exp %351 : vector<8x32xf32>
    %cst_84 = arith.constant 1.000000e+00 : f32
    %353 = vector.broadcast %cst_84 : f32 to vector<8x32xf32>
    %354 = arith.addf %353, %352 : vector<8x32xf32>
    %355 = arith.divf %353, %354 : vector<8x32xf32>
    %356 = arith.mulf %347, %295 : vector<8x32xf32>
    %357 = arith.mulf %341, %349 : vector<8x32xf32>
    %358 = arith.addf %356, %357 : vector<8x32xf32>
    %359 = math.tanh %358 : vector<8x32xf32>
    %360 = arith.mulf %355, %359 : vector<8x32xf32>
    %361 = tpu.concatenate %360, %326 in 1 : vector<8x32xf32>, vector<8x32xf32> -> vector<8x64xf32>
    %cst_85 = arith.constant dense<0.000000e+00> : vector<8x128xf32>
    %362 = tpu.matmul %361, %10, %cst_85 {dimension_numbers = #tpu.dot_dimension_numbers<[1], [0], [0], [1], [0, 0, 1, 1], [], []>} : vector<8x64xf32>, vector<64x128xf32>, vector<8x128xf32> -> vector<8x128xf32>
    %363 = vector.broadcast %11 : vector<1x128xf32> to vector<8x128xf32>
    %364 = arith.addf %362, %363 : vector<8x128xf32>
    %365 = vector.extract_strided_slice %364 {offsets = [0, 0], sizes = [8, 32], strides = [1, 1]} : vector<8x128xf32> to vector<8x32xf32>
    %366 = arith.negf %365 : vector<8x32xf32>
    %367 = math.exp %366 : vector<8x32xf32>
    %cst_86 = arith.constant 1.000000e+00 : f32
    %368 = vector.broadcast %cst_86 : f32 to vector<8x32xf32>
    %369 = arith.addf %368, %367 : vector<8x32xf32>
    %370 = arith.divf %368, %369 : vector<8x32xf32>
    %371 = vector.extract_strided_slice %364 {offsets = [0, 32], sizes = [8, 32], strides = [1, 1]} : vector<8x128xf32> to vector<8x32xf32>
    %372 = arith.negf %371 : vector<8x32xf32>
    %373 = math.exp %372 : vector<8x32xf32>
    %cst_87 = arith.constant 1.000000e+00 : f32
    %374 = vector.broadcast %cst_87 : f32 to vector<8x32xf32>
    %375 = arith.addf %374, %373 : vector<8x32xf32>
    %376 = arith.divf %374, %375 : vector<8x32xf32>
    %377 = vector.extract_strided_slice %364 {offsets = [0, 64], sizes = [8, 32], strides = [1, 1]} : vector<8x128xf32> to vector<8x32xf32>
    %378 = math.tanh %377 : vector<8x32xf32>
    %379 = vector.extract_strided_slice %364 {offsets = [0, 96], sizes = [8, 32], strides = [1, 1]} : vector<8x128xf32> to vector<8x32xf32>
    %380 = arith.negf %379 : vector<8x32xf32>
    %381 = math.exp %380 : vector<8x32xf32>
    %cst_88 = arith.constant 1.000000e+00 : f32
    %382 = vector.broadcast %cst_88 : f32 to vector<8x32xf32>
    %383 = arith.addf %382, %381 : vector<8x32xf32>
    %384 = arith.divf %382, %383 : vector<8x32xf32>
    %385 = arith.mulf %376, %324 : vector<8x32xf32>
    %386 = arith.mulf %370, %378 : vector<8x32xf32>
    %387 = arith.addf %385, %386 : vector<8x32xf32>
    %388 = math.tanh %387 : vector<8x32xf32>
    %389 = arith.mulf %384, %388 : vector<8x32xf32>
    %390 = arith.index_cast %c5_i32 : i32 to index
    %c0_89 = arith.constant 0 : index
    %c0_90 = arith.constant 0 : index
    %391 = vector.load %arg10[%390, %c0_89, %c0_90] : memref<8x8x32xf32, #tpu.memory_space<vmem>>, vector<1x8x32xf32>
    %392 = vector.shape_cast %391 : vector<1x8x32xf32> to vector<8x32xf32>
    %393 = vector.shape_cast %389 : vector<8x32xf32> to vector<1x8x32xf32>
    tpu.vector_store %arg10[%390, %c0_89, %c0_90], %393 {strides = array<i32>} : memref<8x8x32xf32, #tpu.memory_space<vmem>>, vector<1x8x32xf32>,
    %c6_i32 = arith.constant 6 : i32
    %394 = arith.index_cast %c6_i32 : i32 to index
    %c0_91 = arith.constant 0 : index
    %c0_92 = arith.constant 0 : index
    %395 = vector.load %arg9[%394, %c0_91, %c0_92] : memref<8x8x128xf32, #tpu.memory_space<vmem>>, vector<1x8x128xf32>
    %396 = vector.shape_cast %395 : vector<1x8x128xf32> to vector<8x128xf32>
    %cst_93 = arith.constant dense<0.000000e+00> : vector<8x128xf32>
    %397 = tpu.matmul %360, %9, %cst_93 {dimension_numbers = #tpu.dot_dimension_numbers<[1], [0], [0], [1], [0, 0, 1, 1], [], []>} : vector<8x32xf32>, vector<32x128xf32>, vector<8x128xf32> -> vector<8x128xf32>
    %398 = arith.addf %396, %397 : vector<8x128xf32>
    %399 = vector.extract_strided_slice %398 {offsets = [0, 0], sizes = [8, 32], strides = [1, 1]} : vector<8x128xf32> to vector<8x32xf32>
    %400 = arith.negf %399 : vector<8x32xf32>
    %401 = math.exp %400 : vector<8x32xf32>
    %cst_94 = arith.constant 1.000000e+00 : f32
    %402 = vector.broadcast %cst_94 : f32 to vector<8x32xf32>
    %403 = arith.addf %402, %401 : vector<8x32xf32>
    %404 = arith.divf %402, %403 : vector<8x32xf32>
    %405 = vector.extract_strided_slice %398 {offsets = [0, 32], sizes = [8, 32], strides = [1, 1]} : vector<8x128xf32> to vector<8x32xf32>
    %406 = arith.negf %405 : vector<8x32xf32>
    %407 = math.exp %406 : vector<8x32xf32>
    %cst_95 = arith.constant 1.000000e+00 : f32
    %408 = vector.broadcast %cst_95 : f32 to vector<8x32xf32>
    %409 = arith.addf %408, %407 : vector<8x32xf32>
    %410 = arith.divf %408, %409 : vector<8x32xf32>
    %411 = vector.extract_strided_slice %398 {offsets = [0, 64], sizes = [8, 32], strides = [1, 1]} : vector<8x128xf32> to vector<8x32xf32>
    %412 = math.tanh %411 : vector<8x32xf32>
    %413 = vector.extract_strided_slice %398 {offsets = [0, 96], sizes = [8, 32], strides = [1, 1]} : vector<8x128xf32> to vector<8x32xf32>
    %414 = arith.negf %413 : vector<8x32xf32>
    %415 = math.exp %414 : vector<8x32xf32>
    %cst_96 = arith.constant 1.000000e+00 : f32
    %416 = vector.broadcast %cst_96 : f32 to vector<8x32xf32>
    %417 = arith.addf %416, %415 : vector<8x32xf32>
    %418 = arith.divf %416, %417 : vector<8x32xf32>
    %419 = arith.mulf %410, %358 : vector<8x32xf32>
    %420 = arith.mulf %404, %412 : vector<8x32xf32>
    %421 = arith.addf %419, %420 : vector<8x32xf32>
    %422 = math.tanh %421 : vector<8x32xf32>
    %423 = arith.mulf %418, %422 : vector<8x32xf32>
    %424 = tpu.concatenate %423, %389 in 1 : vector<8x32xf32>, vector<8x32xf32> -> vector<8x64xf32>
    %cst_97 = arith.constant dense<0.000000e+00> : vector<8x128xf32>
    %425 = tpu.matmul %424, %10, %cst_97 {dimension_numbers = #tpu.dot_dimension_numbers<[1], [0], [0], [1], [0, 0, 1, 1], [], []>} : vector<8x64xf32>, vector<64x128xf32>, vector<8x128xf32> -> vector<8x128xf32>
    %426 = vector.broadcast %11 : vector<1x128xf32> to vector<8x128xf32>
    %427 = arith.addf %425, %426 : vector<8x128xf32>
    %428 = vector.extract_strided_slice %427 {offsets = [0, 0], sizes = [8, 32], strides = [1, 1]} : vector<8x128xf32> to vector<8x32xf32>
    %429 = arith.negf %428 : vector<8x32xf32>
    %430 = math.exp %429 : vector<8x32xf32>
    %cst_98 = arith.constant 1.000000e+00 : f32
    %431 = vector.broadcast %cst_98 : f32 to vector<8x32xf32>
    %432 = arith.addf %431, %430 : vector<8x32xf32>
    %433 = arith.divf %431, %432 : vector<8x32xf32>
    %434 = vector.extract_strided_slice %427 {offsets = [0, 32], sizes = [8, 32], strides = [1, 1]} : vector<8x128xf32> to vector<8x32xf32>
    %435 = arith.negf %434 : vector<8x32xf32>
    %436 = math.exp %435 : vector<8x32xf32>
    %cst_99 = arith.constant 1.000000e+00 : f32
    %437 = vector.broadcast %cst_99 : f32 to vector<8x32xf32>
    %438 = arith.addf %437, %436 : vector<8x32xf32>
    %439 = arith.divf %437, %438 : vector<8x32xf32>
    %440 = vector.extract_strided_slice %427 {offsets = [0, 64], sizes = [8, 32], strides = [1, 1]} : vector<8x128xf32> to vector<8x32xf32>
    %441 = math.tanh %440 : vector<8x32xf32>
    %442 = vector.extract_strided_slice %427 {offsets = [0, 96], sizes = [8, 32], strides = [1, 1]} : vector<8x128xf32> to vector<8x32xf32>
    %443 = arith.negf %442 : vector<8x32xf32>
    %444 = math.exp %443 : vector<8x32xf32>
    %cst_100 = arith.constant 1.000000e+00 : f32
    %445 = vector.broadcast %cst_100 : f32 to vector<8x32xf32>
    %446 = arith.addf %445, %444 : vector<8x32xf32>
    %447 = arith.divf %445, %446 : vector<8x32xf32>
    %448 = arith.mulf %439, %387 : vector<8x32xf32>
    %449 = arith.mulf %433, %441 : vector<8x32xf32>
    %450 = arith.addf %448, %449 : vector<8x32xf32>
    %451 = math.tanh %450 : vector<8x32xf32>
    %452 = arith.mulf %447, %451 : vector<8x32xf32>
    %453 = arith.index_cast %c6_i32 : i32 to index
    %c0_101 = arith.constant 0 : index
    %c0_102 = arith.constant 0 : index
    %454 = vector.load %arg10[%453, %c0_101, %c0_102] : memref<8x8x32xf32, #tpu.memory_space<vmem>>, vector<1x8x32xf32>
    %455 = vector.shape_cast %454 : vector<1x8x32xf32> to vector<8x32xf32>
    %456 = vector.shape_cast %452 : vector<8x32xf32> to vector<1x8x32xf32>
    tpu.vector_store %arg10[%453, %c0_101, %c0_102], %456 {strides = array<i32>} : memref<8x8x32xf32, #tpu.memory_space<vmem>>, vector<1x8x32xf32>,
    %c7_i32 = arith.constant 7 : i32
    %457 = arith.index_cast %c7_i32 : i32 to index
    %c0_103 = arith.constant 0 : index
    %c0_104 = arith.constant 0 : index
    %458 = vector.load %arg9[%457, %c0_103, %c0_104] : memref<8x8x128xf32, #tpu.memory_space<vmem>>, vector<1x8x128xf32>
    %459 = vector.shape_cast %458 : vector<1x8x128xf32> to vector<8x128xf32>
    %cst_105 = arith.constant dense<0.000000e+00> : vector<8x128xf32>
    %460 = tpu.matmul %423, %9, %cst_105 {dimension_numbers = #tpu.dot_dimension_numbers<[1], [0], [0], [1], [0, 0, 1, 1], [], []>} : vector<8x32xf32>, vector<32x128xf32>, vector<8x128xf32> -> vector<8x128xf32>
    %461 = arith.addf %459, %460 : vector<8x128xf32>
    %462 = vector.extract_strided_slice %461 {offsets = [0, 0], sizes = [8, 32], strides = [1, 1]} : vector<8x128xf32> to vector<8x32xf32>
    %463 = arith.negf %462 : vector<8x32xf32>
    %464 = math.exp %463 : vector<8x32xf32>
    %cst_106 = arith.constant 1.000000e+00 : f32
    %465 = vector.broadcast %cst_106 : f32 to vector<8x32xf32>
    %466 = arith.addf %465, %464 : vector<8x32xf32>
    %467 = arith.divf %465, %466 : vector<8x32xf32>
    %468 = vector.extract_strided_slice %461 {offsets = [0, 32], sizes = [8, 32], strides = [1, 1]} : vector<8x128xf32> to vector<8x32xf32>
    %469 = arith.negf %468 : vector<8x32xf32>
    %470 = math.exp %469 : vector<8x32xf32>
    %cst_107 = arith.constant 1.000000e+00 : f32
    %471 = vector.broadcast %cst_107 : f32 to vector<8x32xf32>
    %472 = arith.addf %471, %470 : vector<8x32xf32>
    %473 = arith.divf %471, %472 : vector<8x32xf32>
    %474 = vector.extract_strided_slice %461 {offsets = [0, 64], sizes = [8, 32], strides = [1, 1]} : vector<8x128xf32> to vector<8x32xf32>
    %475 = math.tanh %474 : vector<8x32xf32>
    %476 = vector.extract_strided_slice %461 {offsets = [0, 96], sizes = [8, 32], strides = [1, 1]} : vector<8x128xf32> to vector<8x32xf32>
    %477 = arith.negf %476 : vector<8x32xf32>
    %478 = math.exp %477 : vector<8x32xf32>
    %cst_108 = arith.constant 1.000000e+00 : f32
    %479 = vector.broadcast %cst_108 : f32 to vector<8x32xf32>
    %480 = arith.addf %479, %478 : vector<8x32xf32>
    %481 = arith.divf %479, %480 : vector<8x32xf32>
    %482 = arith.mulf %473, %421 : vector<8x32xf32>
    %483 = arith.mulf %467, %475 : vector<8x32xf32>
    %484 = arith.addf %482, %483 : vector<8x32xf32>
    %485 = math.tanh %484 : vector<8x32xf32>
    %486 = arith.mulf %481, %485 : vector<8x32xf32>
    %487 = tpu.concatenate %486, %452 in 1 : vector<8x32xf32>, vector<8x32xf32> -> vector<8x64xf32>
    %cst_109 = arith.constant dense<0.000000e+00> : vector<8x128xf32>
    %488 = tpu.matmul %487, %10, %cst_109 {dimension_numbers = #tpu.dot_dimension_numbers<[1], [0], [0], [1], [0, 0, 1, 1], [], []>} : vector<8x64xf32>, vector<64x128xf32>, vector<8x128xf32> -> vector<8x128xf32>
    %489 = vector.broadcast %11 : vector<1x128xf32> to vector<8x128xf32>
    %490 = arith.addf %488, %489 : vector<8x128xf32>
    %491 = vector.extract_strided_slice %490 {offsets = [0, 0], sizes = [8, 32], strides = [1, 1]} : vector<8x128xf32> to vector<8x32xf32>
    %492 = arith.negf %491 : vector<8x32xf32>
    %493 = math.exp %492 : vector<8x32xf32>
    %cst_110 = arith.constant 1.000000e+00 : f32
    %494 = vector.broadcast %cst_110 : f32 to vector<8x32xf32>
    %495 = arith.addf %494, %493 : vector<8x32xf32>
    %496 = arith.divf %494, %495 : vector<8x32xf32>
    %497 = vector.extract_strided_slice %490 {offsets = [0, 32], sizes = [8, 32], strides = [1, 1]} : vector<8x128xf32> to vector<8x32xf32>
    %498 = arith.negf %497 : vector<8x32xf32>
    %499 = math.exp %498 : vector<8x32xf32>
    %cst_111 = arith.constant 1.000000e+00 : f32
    %500 = vector.broadcast %cst_111 : f32 to vector<8x32xf32>
    %501 = arith.addf %500, %499 : vector<8x32xf32>
    %502 = arith.divf %500, %501 : vector<8x32xf32>
    %503 = vector.extract_strided_slice %490 {offsets = [0, 64], sizes = [8, 32], strides = [1, 1]} : vector<8x128xf32> to vector<8x32xf32>
    %504 = math.tanh %503 : vector<8x32xf32>
    %505 = vector.extract_strided_slice %490 {offsets = [0, 96], sizes = [8, 32], strides = [1, 1]} : vector<8x128xf32> to vector<8x32xf32>
    %506 = arith.negf %505 : vector<8x32xf32>
    %507 = math.exp %506 : vector<8x32xf32>
    %cst_112 = arith.constant 1.000000e+00 : f32
    %508 = vector.broadcast %cst_112 : f32 to vector<8x32xf32>
    %509 = arith.addf %508, %507 : vector<8x32xf32>
    %510 = arith.divf %508, %509 : vector<8x32xf32>
    %511 = arith.mulf %502, %450 : vector<8x32xf32>
    %512 = arith.mulf %496, %504 : vector<8x32xf32>
    %513 = arith.addf %511, %512 : vector<8x32xf32>
    %514 = math.tanh %513 : vector<8x32xf32>
    %515 = arith.mulf %510, %514 : vector<8x32xf32>
    %516 = arith.index_cast %c7_i32 : i32 to index
    %c0_113 = arith.constant 0 : index
    %c0_114 = arith.constant 0 : index
    %517 = vector.load %arg10[%516, %c0_113, %c0_114] : memref<8x8x32xf32, #tpu.memory_space<vmem>>, vector<1x8x32xf32>
    %518 = vector.shape_cast %517 : vector<1x8x32xf32> to vector<8x32xf32>
    %519 = vector.shape_cast %515 : vector<8x32xf32> to vector<1x8x32xf32>
    tpu.vector_store %arg10[%516, %c0_113, %c0_114], %519 {strides = array<i32>} : memref<8x8x32xf32, #tpu.memory_space<vmem>>, vector<1x8x32xf32>,
    %c8_i32 = arith.constant 8 : i32
    %c0_115 = arith.constant 0 : index
    %c0_116 = arith.constant 0 : index
    %c0_117 = arith.constant 0 : index
    %520 = vector.load %arg10[%c0_115, %c0_116, %c0_117] : memref<8x8x32xf32, #tpu.memory_space<vmem>>, vector<8x8x32xf32>
    %521 = vector.shape_cast %520 : vector<8x8x32xf32> to vector<64x32xf32>
    %c0_118 = arith.constant 0 : index
    %c0_119 = arith.constant 0 : index
    %522 = vector.load %arg6[%c0_118, %c0_119] : memref<32x16xf32, #tpu.memory_space<vmem>>, vector<32x16xf32>
    %cst_120 = arith.constant dense<0.000000e+00> : vector<64x16xf32>
    %523 = tpu.matmul %521, %522, %cst_120 {dimension_numbers = #tpu.dot_dimension_numbers<[1], [0], [0], [1], [0, 0, 1, 1], [], []>} : vector<64x32xf32>, vector<32x16xf32>, vector<64x16xf32> -> vector<64x16xf32>
    %c0_121 = arith.constant 0 : index
    %c0_122 = arith.constant 0 : index
    %524 = vector.load %arg7[%c0_121, %c0_122] : memref<1x16xf32, #tpu.memory_space<vmem>>, vector<1x16xf32>
    %525 = vector.broadcast %524 : vector<1x16xf32> to vector<64x16xf32>
    %526 = arith.addf %523, %525 : vector<64x16xf32>
    %527 = math.tanh %526 : vector<64x16xf32>
    %528 = vector.shape_cast %527 : vector<64x16xf32> to vector<8x8x16xf32>
    %c0_123 = arith.constant 0 : index
    %c0_124 = arith.constant 0 : index
    %c0_125 = arith.constant 0 : index
    %529 = vector.load %arg8[%c0_123, %c0_124, %c0_125] : memref<8x8x16xf32, #tpu.memory_space<vmem>>, vector<8x8x16xf32>
    tpu.vector_store %arg8[%c0_123, %c0_124, %c0_125], %528 {strides = array<i32>} : memref<8x8x16xf32, #tpu.memory_space<vmem>>, vector<8x8x16xf32>,
    return
  }
}

</mosaic_0001>

<bundles_post_ra>
// kernel: tpu_custom_call.1
= control target key start
LH: loop header
LB: loop body
LE: loop exit
PB: predicated region body
PF: predicated region fallthrough
CT: control target
= control target key end

     0   :  { %13 = vsyncpa [#allocation5], 0  ;;  %s3392_s0 = inlined_call_operand.hbm [shape: f32[8,8,16], index: 0, kind: input, shape index: {}]   ;;  %s3393_s1 = inlined_call_operand.vmem [shape: f32[16,128], index: 1, kind: input, shape index: {}]   ;;  %s3394_s2 = inlined_call_operand.vmem [shape: f32[32,128], index: 2, kind: input, shape index: {}]   ;;  %s3395_s3 = inlined_call_operand.vmem [shape: f32[1,128], index: 3, kind: input, shape index: {}]   ;;  %s3396_s4 = inlined_call_operand.hbm [shape: f32[64,128], index: 4, kind: input, shape index: {}]   ;;  %s3397_s5 = inlined_call_operand.vmem [shape: f32[1,128], index: 5, kind: input, shape index: {}]   ;;  %s3398_s6 = inlined_call_operand.vmem [shape: f32[32,16], index: 6, kind: input, shape index: {}]   ;;  %s3399_s7 = inlined_call_operand.vmem [shape: f32[1,16], index: 7, kind: input, shape index: {}]   ;;  %s3400_s8 = inlined_call_operand.hbm [shape: f32[8,8,16], index: 8, kind: output, shape index: {}]  }
   0x1   :  { %14 = vsyncpa [#allocation8], 0 }
   0x2   :  { %15 = vsyncpa [#allocation6], 0  ;;  %s2785_s27 = smov [#allocation4]  }
   0x3   :  { %s21_s28 = sshll.u32 %s2785_s27, 4  ;;  %s22_s28 = int_to_ptr.vmem [resolvable:$true] %s21_s28 }
   0x4   :  { %s2727_s29 = scalar_lea.vmem %s22_s28, 1024  ;;  %p2732_p1 = scmp.lt.s32.totalorder %s22_s28, %s22_s28 }
   0x5   :  { %p2728_p0 = scmp.ne.s32.totalorder %s22_s28, %s2727_s29  ;;  %p2733_p2 = scmp.lt.s32.totalorder %s2727_s29, %s2727_s29 }
   0x7   :  { %p2734_p3 = por %p2733_p2, %p2732_p1 }
   0x9   :  { %p2735_p4 = pnand %p2734_p3, %p2728_p0 }
   0xb   :  { %2738 = shalt.err (!%p2735_p4)
}
   0xc   :  { %s2786_s30 = smov 128   ;;  %s2787_s9 = smov 8  }
   0xd   :  { %27 = dma.hbm_to_vmem [thread:$0]  %s3392_s0, 1024, %s22_s28, [#allocation5], %s2786_s30, %s2786_s30, %s2787_s9  }
   0xe   :  { %s2788_s12 = smov [#allocation7]  }
   0xf   :  { %s39_s13 = sshll.u32 %s2788_s12, 4  ;;  %s40_s13 = int_to_ptr.vmem [resolvable:$true] %s39_s13 }
  0x10   :  { %s2747_s14 = scalar_lea.vmem %s40_s13, 1024  ;;  %p2752_p6 = scmp.lt.s32.totalorder %s40_s13, %s40_s13 }
  0x11   :  { %p2748_p5 = scmp.ne.s32.totalorder %s40_s13, %s2747_s14  ;;  %p2753_p7 = scmp.lt.s32.totalorder %s2747_s14, %s2747_s14 }
  0x13   :  { %p2754_p8 = por %p2753_p7, %p2752_p6 }
  0x15   :  { %p2755_p9 = pnand %p2754_p8, %p2748_p5 }
  0x17   :  { %2758 = shalt.err (!%p2755_p9)
}
  0x18   :  { %45 = dma.hbm_to_vmem [thread:$0]  %s3396_s4, 1024, %s40_s13, [#allocation8], %s2786_s30, %s2786_s30, %s2787_s9  }
  0x19   :  { %2779 = dma.done.wait [#allocation5], 1024  }
  0x1a   :  { %2780 = vsyncadd [#allocation5], 4294966272 }
  0x1b   :  { %2781 = dma.done.wait [#allocation8], 1024  }
  0x1c   :  { %2782 = vsyncadd [#allocation8], 4294966272  ;;  %v2789_v0 = vmov 0.0   ;;  %vm2790_vm0 = vmmov 0   ;;  %v67_v1 = vld [vmem:[%s3393_s1 + $0x8] sm:$0xff]  ;;  %v2860_v2 = vld [vmem:[%s3394_s2 + $0x18] sm:$0xff] }
  0x1d   :  { %2292 = vmatprep.subr.mxu1 %v2789_v0  ;;  %2300 = vmatprep.mubr.msk.f32.mxu1 %vm2790_vm0, %v2789_v0  ;;  %v66_v3 = vld [vmem:[%s3393_s1] sm:$0xff]  ;;  %v2869_v4 = vld [vmem:[%s3394_s2 + $0x10] sm:$0xff]  ;;  %vm75_vm1 = vcmask 130048   ;;  %v59_v6 = vld [vmem:[#allocation4 + $0x8] sm:$0xff]  ;;  %s2791_s28 = smov 64   ;;  %s2792_s29 = smov 32  }
  0x1e   :  { %2276 = vmatprep.subr.mxu0 %v67_v1  ;;  %2293 = vmatpush3.msra.mxu1 %v2860_v2  ;;  %v58_v5 = vld [vmem:[#allocation4] sm:$0xff]  ;;  %v2876_v7 = vld [vmem:[%s3394_s2 + $0x8] sm:$0xff]  ;;  %v2915_v26 = vld [vmem:[#allocation7 + $0x38] sm:$0xff]  ;;  %vm227_vm2 = vcmask 261120   ;;  %vm337_vm3 = vcmask 523264  }
  0x1f   :  { %2277 = vmatpush3.msra.mxu0 %v67_v1  ;;  %2294 = vmatprep.subr.mxu1 %v2789_v0  ;;  %v2884_v8 = vld [vmem:[%s3394_s2] sm:$0xff]  ;;  %v60_v27 = vld [vmem:[#allocation4 + $0x10] sm:$0xff]  ;;  %v61_v28 = vld [vmem:[#allocation4 + $0x18] sm:$0xff] }
  0x20   :  { %2278 = vmatprep.subr.mxu0 %v66_v3  ;;  %2295 = vmatpush3.msra.mxu1 %v2869_v4  ;;  %v2907_v10 = vld [vmem:[%s3395_s3] ss:$0 sm:$0xff]  ;;  %v2919_v29 = vld [vmem:[#allocation7 + $0x30] sm:$0xff]  ;;  %v2923_v31 = vld [vmem:[#allocation7 + $0x28] sm:$0xff] }
  0x21   :  { %2279 = vmatpush3.msra.mxu0 %v66_v3  ;;  %2280 = vmatprep.mubr.msk.f32.mxu0 %vm75_vm1, %v58_v5  ;;  %v62_v30 = vld [vmem:[#allocation4 + $0x20] sm:$0xff]  ;;  %v63_v32 = vld [vmem:[#allocation4 + $0x28] sm:$0xff]  ;;  %v64_v34 = vld [vmem:[#allocation4 + $0x30] sm:$0xff] }
  0x22   :  { %2296 = vmatprep.subr.mxu1 %v2789_v0  ;;  %2281 = vmatmul.mubr.msk.f32.vlgmr.msra.gmra.mxu0 %vm75_vm1, %v59_v6  ;;  %v2928_v33 = vld [vmem:[#allocation7 + $0x20] sm:$0xff]  ;;  %v2933_v35 = vld [vmem:[#allocation7 + $0x18] sm:$0xff]  ;;  %v2938_v37 = vld [vmem:[#allocation7 + $0x10] sm:$0xff] }
  0x23   :  { %2297 = vmatpush3.msra.mxu1 %v2876_v7  ;;  %2303 = vmatprep.subr.mxu0 %v2789_v0  ;;  %v65_v36 = vld [vmem:[#allocation4 + $0x38] sm:$0xff]  ;;  %v2943_v39 = vld [vmem:[#allocation7 + $0x8] sm:$0xff]  ;;  %v2948_v40 = vld [vmem:[#allocation7] sm:$0xff] }
  0x24   :  { %2298 = vmatprep.subr.mxu1 %v2789_v0  ;;  %2304 = vmatpush3.msra.mxu0 %v2915_v26  ;;  %v3005_v52 = vld [vmem:[%s3397_s5] ss:$0 sm:$0xff] }
  0x25   :  { %2299 = vmatpush3.msra.mxu1 %v2884_v8  ;;  %2283 = vmatprep.mubr.msk.f32.mxu0 %vm75_vm1, %v60_v27 }
  0x26   :  { %2301 = vmatmul.mubr.f32.vlgmr.msra.gmra.mxu1 %v2789_v0  ;;  %2322 = vmatprep.subr.mxu1 %v2789_v0 }
  0x27   :  { %2323 = vmatpush3.msra.mxu1 %v2860_v2  ;;  %2330 = vmatprep.mubr.msk.f32.mxu1 %vm2790_vm0, %v2789_v0 }
  0x28   :  { %2324 = vmatprep.subr.mxu1 %v2789_v0  ;;  %2305 = vmatprep.subr.mxu0 %v2789_v0 }
  0x29   :  { %2325 = vmatpush3.msra.mxu1 %v2869_v4  ;;  %2284 = vmatmul.mubr.msk.f32.gmra.mxu0 %vm75_vm1, %v61_v28 }
  0x2a   :  { %2326 = vmatprep.subr.mxu1 %v2789_v0  ;;  %2306 = vmatpush3.msra.mxu0 %v2919_v29 }
  0x2b   :  { %2327 = vmatpush3.msra.mxu1 %v2876_v7  ;;  %2286 = vmatprep.mubr.msk.f32.mxu0 %vm75_vm1, %v62_v30 }
  0x2c   :  { %2328 = vmatprep.subr.mxu1 %v2789_v0  ;;  %2307 = vmatprep.subr.mxu0 %v2789_v0 }
  0x2d   :  { %2329 = vmatpush3.msra.mxu1 %v2884_v8  ;;  %2308 = vmatpush3.msra.mxu0 %v2923_v31 }
  0x2e   :  { %2333 = vmatprep.subr.mxu1 %v2789_v0  ;;  %2309 = vmatprep.subr.mxu0 %v2789_v0 }
  0x2f   :  { %2287 = vmatmul.mubr.msk.f32.gmra.mxu0 %vm75_vm1, %v63_v32 }
  0x30   :  { %2310 = vmatpush3.msra.mxu0 %v2928_v33  ;;  %2289 = vmatprep.mubr.msk.f32.mxu0 %vm75_vm1, %v64_v34 }
  0x31   :  { %2311 = vmatprep.subr.mxu0 %v2789_v0 }
  0x32   :  { %2312 = vmatpush3.msra.mxu0 %v2933_v35 }
  0x33   :  { %2313 = vmatprep.subr.mxu0 %v2789_v0  ;;  %2290 = vmatmul.mubr.msk.f32.gmra.mxu0 %vm75_vm1, %v65_v36 }
  0x34   :  { %2314 = vmatpush3.msra.mxu0 %v2938_v37  ;;  %2319 = vmatprep.mubr.msk.f32.mxu0 %vm2790_vm0, %v2789_v0 }
  0x35   :  { %2315 = vmatprep.subr.mxu0 %v2789_v0 }
  0x36   :  { %2316 = vmatpush3.msra.mxu0 %v2943_v39 }
  0x37   :  { %2317 = vmatprep.subr.mxu0 %v2789_v0 }
  0x38   :  { %2318 = vmatpush3.msra.mxu0 %v2948_v40 }
  0x39   :  { %2352 = vmatprep.subr.mxu0 %v2789_v0 }
  0xe2   :  { %v2902_v9 = vpop.f32.mrf.mxu0 }
  0xe3   :  { %v172_v50 = vadd.f32 %v2902_v9, %v2907_v10 }
  0xe4   :  { %v166_v11 = vpop.f32.mrf.mxu0 }
  0xe5   :  { %v167_v12 = vadd.f32 %v2907_v10, %v166_v11 }
  0xe6   :  { %v297_v13 = vpop.f32.mrf.mxu1 }
  0xe7   :  { %v301_v14 = vadd.f32 %v297_v13, %v167_v12 }
  0xe8   :  { %v2302_v15 = vpop.f32.mrf.mxu1 }
  0xe9   :  { %2561 = vtanh.f32 %v301_v14  ;;  %v2101_v17 = vmul.f32 -1.442695, %v301_v14  ;;  %v2988_v45 = vpop.f32.mrf.mxu0 }
  0xeb   :  { %2563 = vpow2.f32 %v2101_v17  ;;  %v2990_v46 = vpop.f32.mrf.mxu0 }
  0xec   :  { %v177_v34 = vadd.f32 %v2907_v10, %v2990_v46 }
  0xef   :  { %v2992_v47 = vpop.f32.mrf.mxu0 }
  0xf1   :  { %v2994_v48 = vpop.f32.mrf.mxu0 }
  0xf3   :  { %v2996_v49 = vpop.f32.mrf.mxu0 }
  0xf5   :  { %v3000_v51 = vpop.f32.mrf.mxu0 }
  0xf6   :  { %v2562_v16 = vpop.eup %2561 }
  0xf7   :  { %311 = vrot.lane.b32.xlu0 %v2562_v16, %s2791_s28 }
  0xf8   :  { %v2564_v18 = vpop.eup %2563 }
  0xf9   :  { %v305_v19 = vadd.f32 1.0, %v2564_v18 }
  0xfb   :  { %2565 = vrcp.f32 %v305_v19 }
 0x108   :  { %v2566_v20 = vpop.eup %2565 }
 0x109   :  { %v309_v23 = vmul.f32 0.0, %v2566_v20 }
 0x169   :  { %v312_v21 = vpop.permute.xlu0 %311 }
 0x16a   :  { %v314_v22 = vmul.f32 %v2566_v20, %v312_v21 }
 0x16c   :  { %316 = vrot.lane.b32.xlu0 %v314_v22, %s2792_s29 }
 0x1de   :  { %v317_v24 = vpop.permute.xlu0 %316 }
 0x1df   :  { %v2912_v25 = vadd.f32 %v317_v24, %v309_v23 }
 0x1e1   :  { %2567 = vtanh.f32 %v2912_v25 }
 0x1ee   :  { %v2568_v38 = vpop.eup %2567 }
 0x1ef   :  { %322 = vrot.lane.b32.xlu1 %v2568_v38, %s2791_s28 }
 0x261   :  { %v323_v41 = vpop.permute.xlu1 %322 }
 0x262   :  { %v325_v42 = vmul.f32 %v2566_v20, %v323_v41 }
 0x264   :  { %327 = vrot.lane.b32.xlu1 %v325_v42, %s2792_s29 }
 0x2d6   :  { %v328_v43 = vpop.permute.xlu1 %327 }
 0x2d7   :  { %v330_v44 = vsel %vm227_vm2, %v328_v43, 0.0  ;;  %2331 = vmatmul.mubr.msk.f32.vlgmr.msra.gmra.mxu1 %vm227_vm2, %v328_v43 }
 0x2d8   :  { %2320 = vmatmul.mubr.msk.f32.vlgmr.msra.gmra.mxu0 %vm337_vm3, %v330_v44  ;;  %2334 = vmatpush3.msra.mxu1 %v2915_v26 }
 0x2d9   :  { %2335 = vmatprep.subr.mxu1 %v2789_v0  ;;  %2353 = vmatpush3.msra.mxu0 %v2860_v2 }
 0x2da   :  { %2336 = vmatpush3.msra.mxu1 %v2919_v29  ;;  %2354 = vmatprep.subr.mxu0 %v2789_v0 }
 0x2db   :  { %2337 = vmatprep.subr.mxu1 %v2789_v0  ;;  %2355 = vmatpush3.msra.mxu0 %v2869_v4 }
 0x2dc   :  { %2338 = vmatpush3.msra.mxu1 %v2923_v31  ;;  %2356 = vmatprep.subr.mxu0 %v2789_v0 }
 0x2dd   :  { %2339 = vmatprep.subr.mxu1 %v2789_v0  ;;  %2357 = vmatpush3.msra.mxu0 %v2876_v7 }
 0x2de   :  { %2340 = vmatpush3.msra.mxu1 %v2928_v33  ;;  %2358 = vmatprep.subr.mxu0 %v2789_v0 }
 0x2df   :  { %2341 = vmatprep.subr.mxu1 %v2789_v0  ;;  %2359 = vmatpush3.msra.mxu0 %v2884_v8 }
 0x2e0   :  { %2342 = vmatpush3.msra.mxu1 %v2933_v35  ;;  %2360 = vmatprep.mubr.msk.f32.mxu0 %vm2790_vm0, %v2789_v0 }
 0x2e1   :  { %2343 = vmatprep.subr.mxu1 %v2789_v0  ;;  %2349 = vmatprep.mubr.msk.f32.mxu1 %vm2790_vm0, %v2789_v0 }
 0x2e2   :  { %2344 = vmatpush3.msra.mxu1 %v2938_v37  ;;  %2363 = vmatprep.subr.mxu0 %v2789_v0 }
 0x2e3   :  { %2345 = vmatprep.subr.mxu1 %v2789_v0 }
 0x2e4   :  { %2346 = vmatpush3.msra.mxu1 %v2943_v39 }
 0x2e5   :  { %2347 = vmatprep.subr.mxu1 %v2789_v0 }
 0x2e6   :  { %2348 = vmatpush3.msra.mxu1 %v2948_v40 }
 0x2e7   :  { %2382 = vmatprep.subr.mxu1 %v2789_v0 }
 0x397   :  { %v510_v53 = vpop.f32.mrf.mxu1 }
 0x398   :  { %v514_v54 = vadd.f32 %v510_v53, %v172_v50  ;;  %v407_v55 = vpop.f32.mrf.mxu0 }
 0x399   :  { %v408_v56 = vadd.f32 %v3005_v52, %v407_v55  ;;  %v2332_v57 = vpop.f32.mrf.mxu1 }
 0x39a   :  { %2569 = vtanh.f32 %v514_v54  ;;  %v2321_v58 = vpop.f32.mrf.mxu0  ;;  %v2106_v61 = vmul.f32 -1.442695, %v514_v54 }
 0x39b   :  { %2571 = vtanh.f32 %v408_v56  ;;  %v2104_v62 = vmul.f32 -1.442695, %v408_v56 }
 0x39c   :  { %2573 = vpow2.f32 %v2106_v61 }
 0x39d   :  { %2575 = vpow2.f32 %v2104_v62 }
 0x3a7   :  { %v2570_v59 = vpop.eup %2569 }
 0x3a8   :  { %v2572_v60 = vpop.eup %2571  ;;  %524 = vrot.lane.b32.xlu1 %v2570_v59, %s2791_s28 }
 0x3a9   :  { %420 = vrot.lane.b32.xlu0 %v2572_v60, %s2791_s28  ;;  %v2574_v63 = vpop.eup %2573 }
 0x3aa   :  { %v2576_v1 = vpop.eup %2575  ;;  %v518_v3 = vadd.f32 1.0, %v2574_v63 }
 0x3ab   :  { %v414_v5 = vadd.f32 1.0, %v2576_v1 }
 0x3ac   :  { %2577 = vrcp.f32 %v518_v3 }
 0x3ad   :  { %2579 = vrcp.f32 %v414_v5 }
 0x3b9   :  { %v2578_v6 = vpop.eup %2577 }
 0x3ba   :  { %v2580_v11 = vpop.eup %2579  ;;  %v522_v15 = vmul.f32 %v2578_v6, %v2912_v25 }
 0x3bb   :  { %v418_v17 = vmul.f32 0.0, %v2580_v11 }
 0x41a   :  { %v525_v9 = vpop.permute.xlu1 %524 }
 0x41b   :  { %v527_v12 = vmul.f32 %v2578_v6, %v525_v9  ;;  %v421_v13 = vpop.permute.xlu0 %420 }
 0x41c   :  { %v423_v14 = vmul.f32 %v2580_v11, %v421_v13 }
 0x41d   :  { %529 = vrot.lane.b32.xlu1 %v527_v12, %s2792_s29 }
 0x41e   :  { %425 = vrot.lane.b32.xlu0 %v423_v14, %s2792_s29 }
 0x48f   :  { %v530_v16 = vpop.permute.xlu1 %529 }
 0x490   :  { %v3013_v18 = vadd.f32 %v530_v16, %v522_v15  ;;  %v426_v19 = vpop.permute.xlu0 %425 }
 0x491   :  { %v3015_v20 = vadd.f32 %v426_v19, %v418_v17 }
 0x492   :  { %2581 = vtanh.f32 %v3013_v18 }
 0x493   :  { %2583 = vtanh.f32 %v3015_v20 }
 0x49f   :  { %v2582_v21 = vpop.eup %2581 }
 0x4a0   :  { %v2584_v22 = vpop.eup %2583  ;;  %535 = vrot.lane.b32.xlu1 %v2582_v21, %s2791_s28 }
 0x4a1   :  { %431 = vrot.lane.b32.xlu0 %v2584_v22, %s2791_s28  ;;  %v182_v22 = vadd.f32 %v2988_v45, %v2907_v10 }
 0x512   :  { %v536_v23 = vpop.permute.xlu1 %535 }
 0x513   :  { %v538_v24 = vmul.f32 %v2578_v6, %v536_v23  ;;  %v432_v25 = vpop.permute.xlu0 %431 }
 0x514   :  { %v3021_v27 = vmul.f32 %v2580_v11, %v432_v25 }
 0x515   :  { %540 = vrot.lane.b32.xlu0 %v538_v24, %s2792_s29 }
 0x516   :  { %543 = vrot.lane.b32.xlu1 %v3021_v27, %s2791_s28 }
 0x587   :  { %v541_v28 = vpop.permute.xlu0 %540 }
 0x588   :  { %v544_v30 = vpop.permute.xlu1 %543  ;;  %2361 = vmatmul.mubr.msk.f32.vlgmr.msra.gmra.mxu0 %vm227_vm2, %v541_v28 }
 0x589   :  { %v546_v32 = vsel %vm227_vm2, %v541_v28, %v544_v30  ;;  %2364 = vmatpush3.msra.mxu0 %v2915_v26  ;;  %2379 = vmatprep.mubr.msk.f32.mxu0 %vm2790_vm0, %v2789_v0 }
 0x58a   :  { %2350 = vmatmul.mubr.msk.f32.vlgmr.msra.gmra.mxu1 %vm337_vm3, %v546_v32  ;;  %2365 = vmatprep.subr.mxu0 %v2789_v0 }
 0x58b   :  { %2366 = vmatpush3.msra.mxu0 %v2919_v29  ;;  %2383 = vmatpush3.msra.mxu1 %v2860_v2 }
 0x58c   :  { %2367 = vmatprep.subr.mxu0 %v2789_v0  ;;  %2384 = vmatprep.subr.mxu1 %v2789_v0 }
 0x58d   :  { %2368 = vmatpush3.msra.mxu0 %v2923_v31  ;;  %2385 = vmatpush3.msra.mxu1 %v2869_v4 }
 0x58e   :  { %2369 = vmatprep.subr.mxu0 %v2789_v0  ;;  %2386 = vmatprep.subr.mxu1 %v2789_v0 }
 0x58f   :  { %2370 = vmatpush3.msra.mxu0 %v2928_v33  ;;  %2387 = vmatpush3.msra.mxu1 %v2876_v7 }
 0x590   :  { %2371 = vmatprep.subr.mxu0 %v2789_v0  ;;  %2388 = vmatprep.subr.mxu1 %v2789_v0 }
 0x591   :  { %2372 = vmatpush3.msra.mxu0 %v2933_v35  ;;  %2389 = vmatpush3.msra.mxu1 %v2884_v8 }
 0x592   :  { %2373 = vmatprep.subr.mxu0 %v2789_v0  ;;  %2390 = vmatprep.mubr.msk.f32.mxu1 %vm2790_vm0, %v2789_v0 }
 0x593   :  { %2374 = vmatpush3.msra.mxu0 %v2938_v37  ;;  %2393 = vmatprep.subr.mxu1 %v2789_v0 }
 0x594   :  { %2375 = vmatprep.subr.mxu0 %v2789_v0 }
 0x595   :  { %2376 = vmatpush3.msra.mxu0 %v2943_v39 }
 0x596   :  { %2377 = vmatprep.subr.mxu0 %v2789_v0 }
 0x597   :  { %2378 = vmatpush3.msra.mxu0 %v2948_v40 }
 0x598   :  { %2412 = vmatprep.subr.mxu0 %v2789_v0 }
 0x648   :  { %v720_v36 = vpop.f32.mrf.mxu0 }
 0x649   :  { %v724_v38 = vadd.f32 %v720_v36, %v177_v34 }
 0x64a   :  { %v616_v41 = vpop.f32.mrf.mxu1  ;;  %v2362_v42 = vpop.f32.mrf.mxu0 }
 0x64b   :  { %2585 = vtanh.f32 %v724_v38  ;;  %v617_v43 = vadd.f32 %v3005_v52, %v616_v41  ;;  %v2110_v54 = vmul.f32 -1.442695, %v724_v38 }
 0x64c   :  { %v2351_v44 = vpop.f32.mrf.mxu1 }
 0x64d   :  { %2587 = vtanh.f32 %v617_v43  ;;  %v2108_v55 = vmul.f32 -1.442695, %v617_v43 }
 0x64e   :  { %2589 = vpow2.f32 %v2110_v54 }
 0x64f   :  { %2591 = vpow2.f32 %v2108_v55 }
 0x658   :  { %v2586_v50 = vpop.eup %2585 }
 0x659   :  { %734 = vrot.lane.b32.xlu1 %v2586_v50, %s2791_s28 }
 0x65a   :  { %v2588_v53 = vpop.eup %2587 }
 0x65b   :  { %629 = vrot.lane.b32.xlu0 %v2588_v53, %s2791_s28  ;;  %v2590_v46 = vpop.eup %2589 }
 0x65c   :  { %v2592_v56 = vpop.eup %2591  ;;  %v728_v57 = vadd.f32 1.0, %v2590_v46 }
 0x65d   :  { %v623_v58 = vadd.f32 1.0, %v2592_v56 }
 0x65e   :  { %2593 = vrcp.f32 %v728_v57 }
 0x65f   :  { %2595 = vrcp.f32 %v623_v58 }
 0x66b   :  { %v2594_v59 = vpop.eup %2593 }
 0x66c   :  { %v2596_v62 = vpop.eup %2595  ;;  %v732_v3 = vmul.f32 %v2594_v59, %v3013_v18 }
 0x66d   :  { %v627_v9 = vmul.f32 %v2596_v62, %v3015_v20 }
 0x6cb   :  { %v735_v60 = vpop.permute.xlu1 %734 }
 0x6cc   :  { %v737_v61 = vmul.f32 %v2594_v59, %v735_v60 }
 0x6cd   :  { %v630_v63 = vpop.permute.xlu0 %629 }
 0x6ce   :  { %739 = vrot.lane.b32.xlu1 %v737_v61, %s2792_s29  ;;  %v632_v1 = vmul.f32 %v2596_v62, %v630_v63 }
 0x6d0   :  { %634 = vrot.lane.b32.xlu0 %v632_v1, %s2792_s29 }
 0x740   :  { %v740_v5 = vpop.permute.xlu1 %739 }
 0x741   :  { %v3065_v6 = vadd.f32 %v740_v5, %v732_v3 }
 0x742   :  { %v635_v11 = vpop.permute.xlu0 %634 }
 0x743   :  { %2597 = vtanh.f32 %v3065_v6  ;;  %v3069_v12 = vadd.f32 %v635_v11, %v627_v9 }
 0x745   :  { %2599 = vtanh.f32 %v3069_v12 }
 0x750   :  { %v2598_v13 = vpop.eup %2597 }
 0x751   :  { %745 = vrot.lane.b32.xlu1 %v2598_v13, %s2791_s28 }
 0x752   :  { %v2600_v14 = vpop.eup %2599 }
 0x753   :  { %640 = vrot.lane.b32.xlu0 %v2600_v14, %s2791_s28  ;;  %v187_v14 = vadd.f32 %v2907_v10, %v2994_v48 }
 0x7c3   :  { %v746_v15 = vpop.permute.xlu1 %745 }
 0x7c4   :  { %v748_v16 = vmul.f32 %v2594_v59, %v746_v15 }
 0x7c5   :  { %v641_v17 = vpop.permute.xlu0 %640 }
 0x7c6   :  { %750 = vrot.lane.b32.xlu0 %v748_v16, %s2792_s29  ;;  %v3075_v18 = vmul.f32 %v2596_v62, %v641_v17 }
 0x7c8   :  { %753 = vrot.lane.b32.xlu1 %v3075_v18, %s2791_s28 }
 0x838   :  { %v751_v19 = vpop.permute.xlu0 %750 }
 0x839   :  { %2391 = vmatmul.mubr.msk.f32.vlgmr.msra.gmra.mxu1 %vm227_vm2, %v751_v19 }
 0x83a   :  { %2394 = vmatpush3.msra.mxu1 %v2915_v26  ;;  %2409 = vmatprep.mubr.msk.f32.mxu1 %vm2790_vm0, %v2789_v0  ;;  %v754_v20 = vpop.permute.xlu1 %753 }
 0x83b   :  { %2395 = vmatprep.subr.mxu1 %v2789_v0  ;;  %v756_v21 = vsel %vm227_vm2, %v751_v19, %v754_v20 }
 0x83c   :  { %2396 = vmatpush3.msra.mxu1 %v2919_v29  ;;  %2380 = vmatmul.mubr.msk.f32.vlgmr.msra.gmra.mxu0 %vm337_vm3, %v756_v21 }
 0x83d   :  { %2397 = vmatprep.subr.mxu1 %v2789_v0  ;;  %2413 = vmatpush3.msra.mxu0 %v2860_v2 }
 0x83e   :  { %2398 = vmatpush3.msra.mxu1 %v2923_v31  ;;  %2414 = vmatprep.subr.mxu0 %v2789_v0 }
 0x83f   :  { %2399 = vmatprep.subr.mxu1 %v2789_v0  ;;  %2415 = vmatpush3.msra.mxu0 %v2869_v4 }
 0x840   :  { %2400 = vmatpush3.msra.mxu1 %v2928_v33  ;;  %2416 = vmatprep.subr.mxu0 %v2789_v0 }
 0x841   :  { %2401 = vmatprep.subr.mxu1 %v2789_v0  ;;  %2417 = vmatpush3.msra.mxu0 %v2876_v7 }
 0x842   :  { %2402 = vmatpush3.msra.mxu1 %v2933_v35  ;;  %2418 = vmatprep.subr.mxu0 %v2789_v0 }
 0x843   :  { %2403 = vmatprep.subr.mxu1 %v2789_v0  ;;  %2419 = vmatpush3.msra.mxu0 %v2884_v8 }
 0x844   :  { %2404 = vmatpush3.msra.mxu1 %v2938_v37  ;;  %2420 = vmatprep.mubr.msk.f32.mxu0 %vm2790_vm0, %v2789_v0 }
 0x845   :  { %2405 = vmatprep.subr.mxu1 %v2789_v0  ;;  %2423 = vmatprep.subr.mxu0 %v2789_v0 }
 0x846   :  { %2406 = vmatpush3.msra.mxu1 %v2943_v39 }
 0x847   :  { %2407 = vmatprep.subr.mxu1 %v2789_v0 }
 0x848   :  { %2408 = vmatpush3.msra.mxu1 %v2948_v40 }
 0x849   :  { %2442 = vmatprep.subr.mxu1 %v2789_v0 }
 0x8f9   :  { %v930_v23 = vpop.f32.mrf.mxu1 }
 0x8fa   :  { %v934_v24 = vadd.f32 %v930_v23, %v182_v22 }
 0x8fb   :  { %v2392_v25 = vpop.f32.mrf.mxu1 }
 0x8fc   :  { %2601 = vtanh.f32 %v934_v24  ;;  %v826_v28 = vpop.f32.mrf.mxu0  ;;  %v2114_v38 = vmul.f32 -1.442695, %v934_v24 }
 0x8fd   :  { %v827_v30 = vadd.f32 %v3005_v52, %v826_v28 }
 0x8fe   :  { %v2381_v32 = vpop.f32.mrf.mxu0 }
 0x8ff   :  { %2603 = vtanh.f32 %v827_v30  ;;  %v2112_v41 = vmul.f32 -1.442695, %v827_v30 }
 0x900   :  { %2605 = vpow2.f32 %v2114_v38 }
 0x901   :  { %2607 = vpow2.f32 %v2112_v41 }
 0x909   :  { %v2602_v34 = vpop.eup %2601 }
 0x90a   :  { %944 = vrot.lane.b32.xlu1 %v2602_v34, %s2791_s28 }
 0x90c   :  { %v2604_v36 = vpop.eup %2603 }
 0x90d   :  { %839 = vrot.lane.b32.xlu0 %v2604_v36, %s2791_s28  ;;  %v2606_v45 = vpop.eup %2605 }
 0x90e   :  { %v938_v42 = vadd.f32 1.0, %v2606_v45  ;;  %v2608_v43 = vpop.eup %2607 }
 0x90f   :  { %v833_v44 = vadd.f32 1.0, %v2608_v43 }
 0x910   :  { %2609 = vrcp.f32 %v938_v42 }
 0x911   :  { %2611 = vrcp.f32 %v833_v44 }
 0x91d   :  { %v2610_v50 = vpop.eup %2609 }
 0x91e   :  { %v2612_v55 = vpop.eup %2611  ;;  %v942_v57 = vmul.f32 %v2610_v50, %v3065_v6 }
 0x91f   :  { %v837_v60 = vmul.f32 %v2612_v55, %v3069_v12 }
 0x97c   :  { %v945_v53 = vpop.permute.xlu1 %944 }
 0x97d   :  { %v947_v54 = vmul.f32 %v2610_v50, %v945_v53 }
 0x97f   :  { %949 = vrot.lane.b32.xlu1 %v947_v54, %s2792_s29  ;;  %v840_v46 = vpop.permute.xlu0 %839 }
 0x980   :  { %v842_v56 = vmul.f32 %v2612_v55, %v840_v46 }
 0x982   :  { %844 = vrot.lane.b32.xlu0 %v842_v56, %s2792_s29 }
 0x9f1   :  { %v950_v58 = vpop.permute.xlu1 %949 }
 0x9f2   :  { %v3118_v59 = vadd.f32 %v950_v58, %v942_v57 }
 0x9f4   :  { %2613 = vtanh.f32 %v3118_v59  ;;  %v845_v61 = vpop.permute.xlu0 %844 }
 0x9f5   :  { %v3122_v62 = vadd.f32 %v845_v61, %v837_v60 }
 0x9f7   :  { %2615 = vtanh.f32 %v3122_v62 }
 0xa01   :  { %v2614_v63 = vpop.eup %2613 }
 0xa02   :  { %955 = vrot.lane.b32.xlu1 %v2614_v63, %s2791_s28 }
 0xa04   :  { %v2616_v1 = vpop.eup %2615 }
 0xa05   :  { %850 = vrot.lane.b32.xlu0 %v2616_v1, %s2791_s28 }
 0xa74   :  { %v956_v3 = vpop.permute.xlu1 %955 }
 0xa75   :  { %v958_v5 = vmul.f32 %v2610_v50, %v956_v3 }
 0xa77   :  { %960 = vrot.lane.b32.xlu0 %v958_v5, %s2792_s29  ;;  %v851_v6 = vpop.permute.xlu0 %850 }
 0xa78   :  { %v3128_v9 = vmul.f32 %v2612_v55, %v851_v6 }
 0xa7a   :  { %963 = vrot.lane.b32.xlu1 %v3128_v9, %s2791_s28 }
 0xae9   :  { %v961_v11 = vpop.permute.xlu0 %960 }
 0xaea   :  { %2421 = vmatmul.mubr.msk.f32.vlgmr.msra.gmra.mxu0 %vm227_vm2, %v961_v11 }
 0xaeb   :  { %2424 = vmatpush3.msra.mxu0 %v2915_v26  ;;  %2439 = vmatprep.mubr.msk.f32.mxu0 %vm2790_vm0, %v2789_v0 }
 0xaec   :  { %2425 = vmatprep.subr.mxu0 %v2789_v0  ;;  %v964_v12 = vpop.permute.xlu1 %963 }
 0xaed   :  { %2426 = vmatpush3.msra.mxu0 %v2919_v29  ;;  %v966_v13 = vsel %vm227_vm2, %v961_v11, %v964_v12 }
 0xaee   :  { %2427 = vmatprep.subr.mxu0 %v2789_v0  ;;  %2410 = vmatmul.mubr.msk.f32.vlgmr.msra.gmra.mxu1 %vm337_vm3, %v966_v13 }
 0xaef   :  { %2428 = vmatpush3.msra.mxu0 %v2923_v31  ;;  %2443 = vmatpush3.msra.mxu1 %v2860_v2 }
 0xaf0   :  { %2429 = vmatprep.subr.mxu0 %v2789_v0  ;;  %2444 = vmatprep.subr.mxu1 %v2789_v0 }
 0xaf1   :  { %2430 = vmatpush3.msra.mxu0 %v2928_v33  ;;  %2445 = vmatpush3.msra.mxu1 %v2869_v4 }
 0xaf2   :  { %2431 = vmatprep.subr.mxu0 %v2789_v0  ;;  %2446 = vmatprep.subr.mxu1 %v2789_v0 }
 0xaf3   :  { %2432 = vmatpush3.msra.mxu0 %v2933_v35  ;;  %2447 = vmatpush3.msra.mxu1 %v2876_v7 }
 0xaf4   :  { %2433 = vmatprep.subr.mxu0 %v2789_v0  ;;  %2448 = vmatprep.subr.mxu1 %v2789_v0 }
 0xaf5   :  { %2450 = vmatprep.mubr.msk.f32.mxu1 %vm2790_vm0, %v2789_v0  ;;  %2449 = vmatpush3.msra.mxu1 %v2884_v8 }
 0xaf6   :  { %2434 = vmatpush3.msra.mxu0 %v2938_v37  ;;  %2453 = vmatprep.subr.mxu1 %v2789_v0 }
 0xaf7   :  { %2435 = vmatprep.subr.mxu0 %v2789_v0 }
 0xaf8   :  { %2436 = vmatpush3.msra.mxu0 %v2943_v39 }
 0xaf9   :  { %2437 = vmatprep.subr.mxu0 %v2789_v0 }
 0xafa   :  { %2438 = vmatpush3.msra.mxu0 %v2948_v40 }
 0xafb   :  { %2472 = vmatprep.subr.mxu0 %v2789_v0 }
 0xbaa   :  { %v1140_v15 = vpop.f32.mrf.mxu0 }
 0xbab   :  { %v1144_v16 = vadd.f32 %v1140_v15, %v187_v14 }
 0xbac   :  { %v2422_v17 = vpop.f32.mrf.mxu0 }
 0xbad   :  { %2617 = vtanh.f32 %v1144_v16  ;;  %v2118_v24 = vmul.f32 -1.442695, %v1144_v16 }
 0xbae   :  { %v1036_v19 = vpop.f32.mrf.mxu1 }
 0xbaf   :  { %v1037_v20 = vadd.f32 %v3005_v52, %v1036_v19 }
 0xbb0   :  { %v2411_v21 = vpop.f32.mrf.mxu1 }
 0xbb1   :  { %2619 = vtanh.f32 %v1037_v20  ;;  %v2116_v25 = vmul.f32 -1.442695, %v1037_v20 }
 0xbb2   :  { %2621 = vpow2.f32 %v2118_v24 }
 0xbb3   :  { %2623 = vpow2.f32 %v2116_v25 }
 0xbba   :  { %v2618_v22 = vpop.eup %2617 }
 0xbbb   :  { %1154 = vrot.lane.b32.xlu1 %v2618_v22, %s2791_s28 }
 0xbbe   :  { %v2620_v23 = vpop.eup %2619 }
 0xbbf   :  { %1049 = vrot.lane.b32.xlu0 %v2620_v23, %s2791_s28  ;;  %v2622_v48 = vpop.eup %2621 }
 0xbc0   :  { %v1148_v28 = vadd.f32 1.0, %v2622_v48  ;;  %v2624_v30 = vpop.eup %2623 }
 0xbc1   :  { %v1043_v32 = vadd.f32 1.0, %v2624_v30 }
 0xbc2   :  { %2625 = vrcp.f32 %v1148_v28 }
 0xbc3   :  { %2627 = vrcp.f32 %v1043_v32 }
 0xbcf   :  { %v2626_v34 = vpop.eup %2625 }
 0xbd0   :  { %v2628_v41 = vpop.eup %2627  ;;  %v1152_v43 = vmul.f32 %v2626_v34, %v3118_v59 }
 0xbd1   :  { %v1047_v53 = vmul.f32 %v2628_v41, %v3122_v62 }
 0xc2d   :  { %v1155_v36 = vpop.permute.xlu1 %1154 }
 0xc2e   :  { %v1157_v38 = vmul.f32 %v2626_v34, %v1155_v36 }
 0xc30   :  { %1159 = vrot.lane.b32.xlu1 %v1157_v38, %s2792_s29 }
 0xc31   :  { %v1050_v45 = vpop.permute.xlu0 %1049 }
 0xc32   :  { %v1052_v42 = vmul.f32 %v2628_v41, %v1050_v45 }
 0xc34   :  { %1054 = vrot.lane.b32.xlu0 %v1052_v42, %s2792_s29 }
 0xca2   :  { %v1160_v44 = vpop.permute.xlu1 %1159 }
 0xca3   :  { %v3171_v50 = vadd.f32 %v1160_v44, %v1152_v43 }
 0xca5   :  { %2629 = vtanh.f32 %v3171_v50 }
 0xca6   :  { %v1055_v54 = vpop.permute.xlu0 %1054 }
 0xca7   :  { %v3175_v55 = vadd.f32 %v1055_v54, %v1047_v53 }
 0xca9   :  { %2631 = vtanh.f32 %v3175_v55 }
 0xcb2   :  { %v2630_v46 = vpop.eup %2629 }
 0xcb3   :  { %1165 = vrot.lane.b32.xlu1 %v2630_v46, %s2791_s28 }
 0xcb6   :  { %v2632_v56 = vpop.eup %2631 }
 0xcb7   :  { %1060 = vrot.lane.b32.xlu0 %v2632_v56, %s2791_s28 }
 0xd25   :  { %v1166_v57 = vpop.permute.xlu1 %1165 }
 0xd26   :  { %v1168_v58 = vmul.f32 %v2626_v34, %v1166_v57 }
 0xd28   :  { %1170 = vrot.lane.b32.xlu0 %v1168_v58, %s2792_s29 }
 0xd29   :  { %v1061_v59 = vpop.permute.xlu0 %1060 }
 0xd2a   :  { %v3181_v60 = vmul.f32 %v2628_v41, %v1061_v59 }
 0xd2c   :  { %1173 = vrot.lane.b32.xlu1 %v3181_v60, %s2791_s28 }
 0xd9a   :  { %v1171_v61 = vpop.permute.xlu0 %1170 }
 0xd9b   :  { %2451 = vmatmul.mubr.msk.f32.vlgmr.msra.gmra.mxu1 %vm227_vm2, %v1171_v61 }
 0xd9c   :  { %2454 = vmatpush3.msra.mxu1 %v2915_v26  ;;  %2469 = vmatprep.mubr.msk.f32.mxu1 %vm2790_vm0, %v2789_v0 }
 0xd9d   :  { %2455 = vmatprep.subr.mxu1 %v2789_v0 }
 0xd9e   :  { %2456 = vmatpush3.msra.mxu1 %v2919_v29  ;;  %v1174_v62 = vpop.permute.xlu1 %1173 }
 0xd9f   :  { %2457 = vmatprep.subr.mxu1 %v2789_v0  ;;  %v1176_v63 = vsel %vm227_vm2, %v1171_v61, %v1174_v62 }
 0xda0   :  { %2458 = vmatpush3.msra.mxu1 %v2923_v31  ;;  %2440 = vmatmul.mubr.msk.f32.vlgmr.msra.gmra.mxu0 %vm337_vm3, %v1176_v63 }
 0xda1   :  { %2459 = vmatprep.subr.mxu1 %v2789_v0  ;;  %2473 = vmatpush3.msra.mxu0 %v2860_v2  ;;  %v192_v2 = vadd.f32 %v2992_v47, %v2907_v10 }
 0xda2   :  { %2460 = vmatpush3.msra.mxu1 %v2928_v33  ;;  %2474 = vmatprep.subr.mxu0 %v2789_v0 }
 0xda3   :  { %2461 = vmatprep.subr.mxu1 %v2789_v0  ;;  %2475 = vmatpush3.msra.mxu0 %v2869_v4 }
 0xda4   :  { %2462 = vmatpush3.msra.mxu1 %v2933_v35  ;;  %2476 = vmatprep.subr.mxu0 %v2789_v0 }
 0xda5   :  { %2480 = vmatprep.mubr.msk.f32.mxu0 %vm2790_vm0, %v2789_v0  ;;  %2477 = vmatpush3.msra.mxu0 %v2876_v7 }
 0xda6   :  { %2463 = vmatprep.subr.mxu1 %v2789_v0  ;;  %2478 = vmatprep.subr.mxu0 %v2789_v0 }
 0xda7   :  { %2464 = vmatpush3.msra.mxu1 %v2938_v37  ;;  %2479 = vmatpush3.msra.mxu0 %v2884_v8 }
 0xda8   :  { %2465 = vmatprep.subr.mxu1 %v2789_v0  ;;  %2483 = vmatprep.subr.mxu0 %v2789_v0 }
 0xda9   :  { %2466 = vmatpush3.msra.mxu1 %v2943_v39 }
 0xdaa   :  { %2467 = vmatprep.subr.mxu1 %v2789_v0 }
 0xdab   :  { %2468 = vmatpush3.msra.mxu1 %v2948_v40 }
 0xdac   :  { %2502 = vmatprep.subr.mxu1 %v2789_v0 }
 0xe5b   :  { %v1350_v4 = vpop.f32.mrf.mxu1 }
 0xe5c   :  { %v1354_v7 = vadd.f32 %v1350_v4, %v192_v2 }
 0xe5d   :  { %v2452_v1 = vpop.f32.mrf.mxu1 }
 0xe5e   :  { %2633 = vtanh.f32 %v1354_v7  ;;  %v2122_v12 = vmul.f32 -1.442695, %v1354_v7 }
 0xe60   :  { %v1246_v8 = vpop.f32.mrf.mxu0 }
 0xe61   :  { %v1247_v3 = vadd.f32 %v3005_v52, %v1246_v8 }
 0xe62   :  { %v2441_v5 = vpop.f32.mrf.mxu0 }
 0xe63   :  { %2635 = vtanh.f32 %v1247_v3  ;;  %v2120_v13 = vmul.f32 -1.442695, %v1247_v3 }
 0xe64   :  { %2637 = vpow2.f32 %v2122_v12 }
 0xe65   :  { %2639 = vpow2.f32 %v2120_v13 }
 0xe6b   :  { %v2634_v6 = vpop.eup %2633 }
 0xe6c   :  { %1364 = vrot.lane.b32.xlu1 %v2634_v6, %s2791_s28 }
 0xe70   :  { %v2636_v11 = vpop.eup %2635 }
 0xe71   :  { %1259 = vrot.lane.b32.xlu0 %v2636_v11, %s2791_s28  ;;  %v2638_v47 = vpop.eup %2637 }
 0xe72   :  { %v1358_v14 = vadd.f32 1.0, %v2638_v47  ;;  %v2640_v15 = vpop.eup %2639 }
 0xe73   :  { %v1253_v16 = vadd.f32 1.0, %v2640_v15 }
 0xe74   :  { %2641 = vrcp.f32 %v1358_v14 }
 0xe75   :  { %2643 = vrcp.f32 %v1253_v16 }
 0xe81   :  { %v2642_v17 = vpop.eup %2641 }
 0xe82   :  { %v2644_v21 = vpop.eup %2643  ;;  %v1362_v24 = vmul.f32 %v2642_v17, %v3171_v50 }
 0xe83   :  { %v1257_v28 = vmul.f32 %v2644_v21, %v3175_v55 }
 0xede   :  { %v1365_v19 = vpop.permute.xlu1 %1364 }
 0xedf   :  { %v1367_v20 = vmul.f32 %v2642_v17, %v1365_v19 }
 0xee1   :  { %1369 = vrot.lane.b32.xlu1 %v1367_v20, %s2792_s29  ;;  %v2709_v20 = vld [vmem:[#allocation7 + $0x38] sm:$0xff] }
 0xee3   :  { %v1260_v22 = vpop.permute.xlu0 %1259 }
 0xee4   :  { %v1262_v23 = vmul.f32 %v2644_v21, %v1260_v22  ;;  %v2711_v22 = vld [vmem:[#allocation7 + $0x28] sm:$0xff] }
 0xee6   :  { %1264 = vrot.lane.b32.xlu0 %v1262_v23, %s2792_s29 }
 0xf53   :  { %v1370_v25 = vpop.permute.xlu1 %1369 }
 0xf54   :  { %v3224_v48 = vadd.f32 %v1370_v25, %v1362_v24  ;;  %v2712_v25 = vld [vmem:[#allocation7 + $0x20] sm:$0xff] }
 0xf56   :  { %2645 = vtanh.f32 %v3224_v48 }
 0xf58   :  { %v1265_v30 = vpop.permute.xlu0 %1264 }
 0xf59   :  { %v3228_v32 = vadd.f32 %v1265_v30, %v1257_v28  ;;  %v2714_v28 = vld [vmem:[#allocation7 + $0x10] sm:$0xff]  ;;  %v2715_v30 = vld [vmem:[#allocation7 + $0x8] sm:$0xff] }
 0xf5b   :  { %2647 = vtanh.f32 %v3228_v32 }
 0xf63   :  { %v2646_v34 = vpop.eup %2645 }
 0xf64   :  { %1375 = vrot.lane.b32.xlu1 %v2646_v34, %s2791_s28  ;;  %v2717_v34 = vld [vmem:[%s3395_s3] ss:$0 sm:$0xff] }
 0xf68   :  { %v2648_v36 = vpop.eup %2647 }
 0xf69   :  { %1270 = vrot.lane.b32.xlu0 %v2648_v36, %s2791_s28  ;;  %v202_v36 = vadd.f32 %v2717_v34, %v2996_v49 }
 0xfd6   :  { %v1376_v38 = vpop.permute.xlu1 %1375 }
 0xfd7   :  { %v1378_v41 = vmul.f32 %v2642_v17, %v1376_v38 }
 0xfd9   :  { %1380 = vrot.lane.b32.xlu0 %v1378_v41, %s2792_s29 }
 0xfdb   :  { %v1271_v45 = vpop.permute.xlu0 %1270 }
 0xfdc   :  { %v3234_v42 = vmul.f32 %v2644_v21, %v1271_v45  ;;  %v2710_v21 = vld [vmem:[#allocation7 + $0x30] sm:$0xff] }
 0xfde   :  { %1383 = vrot.lane.b32.xlu1 %v3234_v42, %s2791_s28 }
0x104b   :  { %v1381_v43 = vpop.permute.xlu0 %1380 }
0x104c   :  { %2481 = vmatmul.mubr.msk.f32.vlgmr.msra.gmra.mxu0 %vm227_vm2, %v1381_v43 }
0x104d   :  { %2484 = vmatpush3.msra.mxu0 %v2915_v26  ;;  %2499 = vmatprep.mubr.msk.f32.mxu0 %vm2790_vm0, %v2789_v0  ;;  %v2705_v26 = vld [vmem:[%s3394_s2 + $0x18] sm:$0xff] }
0x104e   :  { %2485 = vmatprep.subr.mxu0 %v2789_v0 }
0x104f   :  { %2486 = vmatpush3.msra.mxu0 %v2919_v29  ;;  %v2706_v29 = vld [vmem:[%s3394_s2 + $0x10] sm:$0xff] }
0x1050   :  { %2487 = vmatprep.subr.mxu0 %v2789_v0  ;;  %v1384_v44 = vpop.permute.xlu1 %1383 }
0x1051   :  { %2488 = vmatpush3.msra.mxu0 %v2923_v31  ;;  %v1386_v50 = vsel %vm227_vm2, %v1381_v43, %v1384_v44  ;;  %v2707_v31 = vld [vmem:[%s3394_s2 + $0x8] sm:$0xff] }
0x1052   :  { %2489 = vmatprep.subr.mxu0 %v2789_v0  ;;  %2470 = vmatmul.mubr.msk.f32.vlgmr.msra.gmra.mxu1 %vm337_vm3, %v1386_v50 }
0x1053   :  { %2490 = vmatpush3.msra.mxu0 %v2928_v33  ;;  %2503 = vmatpush3.msra.mxu1 %v2705_v26  ;;  %v2708_v33 = vld [vmem:[%s3394_s2] sm:$0xff] }
0x1054   :  { %2491 = vmatprep.subr.mxu0 %v2789_v0  ;;  %2504 = vmatprep.subr.mxu1 %v2789_v0 }
0x1055   :  { %2510 = vmatprep.mubr.msk.f32.mxu1 %vm2790_vm0, %v2789_v0  ;;  %2505 = vmatpush3.msra.mxu1 %v2706_v29 }
0x1056   :  { %2492 = vmatpush3.msra.mxu0 %v2933_v35  ;;  %2506 = vmatprep.subr.mxu1 %v2789_v0  ;;  %v197_v35 = vadd.f32 %v2907_v10, %v3000_v51 }
0x1057   :  { %2493 = vmatprep.subr.mxu0 %v2789_v0  ;;  %2507 = vmatpush3.msra.mxu1 %v2707_v31 }
0x1058   :  { %2494 = vmatpush3.msra.mxu0 %v2938_v37  ;;  %2508 = vmatprep.subr.mxu1 %v2789_v0 }
0x1059   :  { %2495 = vmatprep.subr.mxu0 %v2789_v0  ;;  %2509 = vmatpush3.msra.mxu1 %v2708_v33 }
0x105a   :  { %2496 = vmatpush3.msra.mxu0 %v2943_v39  ;;  %2513 = vmatprep.subr.mxu1 %v2789_v0 }
0x105b   :  { %2497 = vmatprep.subr.mxu0 %v2789_v0 }
0x105c   :  { %2498 = vmatpush3.msra.mxu0 %v2948_v40 }
0x110c   :  { %v1560_v37 = vpop.f32.mrf.mxu0 }
0x110d   :  { %v1564_v53 = vadd.f32 %v1560_v37, %v197_v35 }
0x110e   :  { %v2482_v54 = vpop.f32.mrf.mxu0 }
0x110f   :  { %2649 = vtanh.f32 %v1564_v53  ;;  %v2126_v58 = vmul.f32 -1.442695, %v1564_v53 }
0x1112   :  { %v1456_v55 = vpop.f32.mrf.mxu1 }
0x1113   :  { %v1457_v46 = vadd.f32 %v3005_v52, %v1456_v55 }
0x1114   :  { %v2471_v56 = vpop.f32.mrf.mxu1 }
0x1115   :  { %2651 = vtanh.f32 %v1457_v46  ;;  %v2124_v40 = vmul.f32 -1.442695, %v1457_v46 }
0x1116   :  { %2653 = vpow2.f32 %v2126_v58 }
0x1117   :  { %2655 = vpow2.f32 %v2124_v40 }
0x111c   :  { %v2650_v57 = vpop.eup %2649 }
0x111d   :  { %1574 = vrot.lane.b32.xlu1 %v2650_v57, %s2791_s28 }
0x1122   :  { %v2652_v39 = vpop.eup %2651 }
0x1123   :  { %1469 = vrot.lane.b32.xlu0 %v2652_v39, %s2791_s28  ;;  %v2654_v10 = vpop.eup %2653 }
0x1124   :  { %v1568_v51 = vadd.f32 1.0, %v2654_v10  ;;  %v2656_v59 = vpop.eup %2655 }
0x1125   :  { %v1463_v61 = vadd.f32 1.0, %v2656_v59 }
0x1126   :  { %2657 = vrcp.f32 %v1568_v51 }
0x1127   :  { %2659 = vrcp.f32 %v1463_v61 }
0x1133   :  { %v2658_v62 = vpop.eup %2657 }
0x1134   :  { %v2660_v4 = vpop.eup %2659  ;;  %v1572_v8 = vmul.f32 %v2658_v62, %v3224_v48  ;;  %v2713_v48 = vld [vmem:[#allocation7 + $0x18] sm:$0xff] }
0x1135   :  { %v1467_v6 = vmul.f32 %v2660_v4, %v3228_v32  ;;  %v2716_v32 = vld [vmem:[#allocation7] sm:$0xff] }
0x118f   :  { %v1575_v63 = vpop.permute.xlu1 %1574 }
0x1190   :  { %v1577_v2 = vmul.f32 %v2658_v62, %v1575_v63 }
0x1192   :  { %1579 = vrot.lane.b32.xlu1 %v1577_v2, %s2792_s29 }
0x1195   :  { %v1470_v7 = vpop.permute.xlu0 %1469 }
0x1196   :  { %v1472_v1 = vmul.f32 %v2660_v4, %v1470_v7 }
0x1198   :  { %1474 = vrot.lane.b32.xlu0 %v1472_v1, %s2792_s29 }
0x1204   :  { %v1580_v3 = vpop.permute.xlu1 %1579 }
0x1205   :  { %v3284_v5 = vadd.f32 %v1580_v3, %v1572_v8 }
0x1207   :  { %2661 = vtanh.f32 %v3284_v5 }
0x120a   :  { %v1475_v11 = vpop.permute.xlu0 %1474 }
0x120b   :  { %v3288_v12 = vadd.f32 %v1475_v11, %v1467_v6 }
0x120d   :  { %2663 = vtanh.f32 %v3288_v12 }
0x1214   :  { %v2662_v13 = vpop.eup %2661 }
0x1215   :  { %1585 = vrot.lane.b32.xlu1 %v2662_v13, %s2791_s28 }
0x121a   :  { %v2664_v47 = vpop.eup %2663 }
0x121b   :  { %1480 = vrot.lane.b32.xlu0 %v2664_v47, %s2791_s28 }
0x1287   :  { %v1586_v14 = vpop.permute.xlu1 %1585 }
0x1288   :  { %v1588_v15 = vmul.f32 %v2658_v62, %v1586_v14 }
0x128a   :  { %1590 = vrot.lane.b32.xlu0 %v1588_v15, %s2792_s29 }
0x128d   :  { %v1481_v16 = vpop.permute.xlu0 %1480 }
0x128e   :  { %v3294_v17 = vmul.f32 %v2660_v4, %v1481_v16 }
0x1290   :  { %1593 = vrot.lane.b32.xlu1 %v3294_v17, %s2791_s28 }
0x12fc   :  { %v1591_v19 = vpop.permute.xlu0 %1590 }
0x12fd   :  { %2511 = vmatmul.mubr.msk.f32.vlgmr.msra.gmra.mxu1 %vm227_vm2, %v1591_v19 }
0x12fe   :  { %2514 = vmatpush3.msra.mxu1 %v2709_v20  ;;  %2529 = vmatprep.mubr.msk.f32.mxu1 %vm2790_vm0, %v2789_v0 }
0x12ff   :  { %2515 = vmatprep.subr.mxu1 %v2789_v0 }
0x1300   :  { %2516 = vmatpush3.msra.mxu1 %v2710_v21 }
0x1301   :  { %2517 = vmatprep.subr.mxu1 %v2789_v0 }
0x1302   :  { %2518 = vmatpush3.msra.mxu1 %v2711_v22  ;;  %v1594_v23 = vpop.permute.xlu1 %1593 }
0x1303   :  { %2519 = vmatprep.subr.mxu1 %v2789_v0  ;;  %v1596_v24 = vsel %vm227_vm2, %v1591_v19, %v1594_v23 }
0x1304   :  { %2520 = vmatpush3.msra.mxu1 %v2712_v25  ;;  %2500 = vmatmul.mubr.msk.f32.vlgmr.msra.gmra.mxu0 %vm337_vm3, %v1596_v24  ;;  %v1921_v24 = vld [vmem:[%s3398_s6 + $0x18] sm:$0xff] }
0x1305   :  { %2521 = vmatprep.subr.mxu1 %v2789_v0  ;;  %2532 = vmatprep.subr.mxu0 %v1921_v24 }
0x1306   :  { %2522 = vmatpush3.msra.mxu1 %v2713_v48  ;;  %2533 = vmatpush3.msra.mxu0 %v1921_v24 }
0x1307   :  { %2523 = vmatprep.subr.mxu1 %v2789_v0 }
0x1308   :  { %2524 = vmatpush3.msra.mxu1 %v2714_v28  ;;  %v1918_v28 = vld [vmem:[%s3398_s6] sm:$0xff] }
0x1309   :  { %2525 = vmatprep.subr.mxu1 %v2789_v0 }
0x130a   :  { %2526 = vmatpush3.msra.mxu1 %v2715_v30 }
0x130b   :  { %2527 = vmatprep.subr.mxu1 %v2789_v0 }
0x130c   :  { %2528 = vmatpush3.msra.mxu1 %v2716_v32 }
0x13bd   :  { %v1770_v38 = vpop.f32.mrf.mxu1 }
0x13be   :  { %v1774_v41 = vadd.f32 %v1770_v38, %v202_v36 }
0x13bf   :  { %v2512_v45 = vpop.f32.mrf.mxu1 }
0x13c0   :  { %2665 = vtanh.f32 %v1774_v41  ;;  %v2130_v29 = vmul.f32 -1.442695, %v1774_v41 }
0x13c4   :  { %v1666_v43 = vpop.f32.mrf.mxu0 }
0x13c5   :  { %v1667_v44 = vadd.f32 %v3005_v52, %v1666_v43 }
0x13c6   :  { %v2501_v50 = vpop.f32.mrf.mxu0 }
0x13c7   :  { %2667 = vtanh.f32 %v1667_v44  ;;  %v2128_v31 = vmul.f32 -1.442695, %v1667_v44 }
0x13c8   :  { %2669 = vpow2.f32 %v2130_v29  ;;  %v2133_v29 = vld [vmem:[%s3399_s7] ss:$0 sm:$0xff]  ;;  %s2793_s7 = smov [#allocation9]  }
0x13c9   :  { %2671 = vpow2.f32 %v2128_v31  ;;  %s2079_s27 = sshll.u32 %s2793_s7, 4  ;;  %s2080_s27 = int_to_ptr.vmem [resolvable:$true] %s2079_s27 }
0x13ca   :  { %p2764_p11 = scmp.lt.s32.totalorder %s2080_s27, %s2080_s27 }
0x13cd   :  { %v2666_v26 = vpop.eup %2665 }
0x13ce   :  { %1784 = vrot.lane.b32.xlu1 %v2666_v26, %s2791_s28 }
0x13d4   :  { %v2668_v0 = vpop.eup %2667 }
0x13d5   :  { %1679 = vrot.lane.b32.xlu0 %v2668_v0, %s2791_s28  ;;  %v2670_v49 = vpop.eup %2669 }
0x13d6   :  { %v1778_v33 = vadd.f32 1.0, %v2670_v49  ;;  %v2672_v35 = vpop.eup %2671 }
0x13d7   :  { %v1673_v37 = vadd.f32 1.0, %v2672_v35 }
0x13d8   :  { %2673 = vrcp.f32 %v1778_v33 }
0x13d9   :  { %2675 = vrcp.f32 %v1673_v37 }
0x13e5   :  { %v2674_v53 = vpop.eup %2673 }
0x13e6   :  { %v2676_v55 = vpop.eup %2675  ;;  %v1782_v57 = vmul.f32 %v2674_v53, %v3284_v5  ;;  %v2718_v5 = vld [vmem:[%s3397_s5] ss:$0 sm:$0xff] }
0x13e7   :  { %v1677_v40 = vmul.f32 %v2676_v55, %v3288_v12 }
0x1440   :  { %v1785_v52 = vpop.permute.xlu1 %1784 }
0x1441   :  { %v1787_v54 = vmul.f32 %v2674_v53, %v1785_v52 }
0x1443   :  { %1789 = vrot.lane.b32.xlu1 %v1787_v54, %s2792_s29 }
0x1447   :  { %v1680_v46 = vpop.permute.xlu0 %1679 }
0x1448   :  { %v1682_v56 = vmul.f32 %v2676_v55, %v1680_v46 }
0x144a   :  { %1684 = vrot.lane.b32.xlu0 %v1682_v56, %s2792_s29 }
0x14b5   :  { %v1790_v39 = vpop.permute.xlu1 %1789 }
0x14b6   :  { %v1792_v58 = vadd.f32 %v1790_v39, %v1782_v57 }
0x14b8   :  { %2677 = vtanh.f32 %v1792_v58 }
0x14bc   :  { %v1685_v10 = vpop.permute.xlu0 %1684 }
0x14bd   :  { %v1687_v51 = vadd.f32 %v1685_v10, %v1677_v40 }
0x14bf   :  { %2679 = vtanh.f32 %v1687_v51 }
0x14c5   :  { %v2678_v59 = vpop.eup %2677 }
0x14c6   :  { %1795 = vrot.lane.b32.xlu1 %v2678_v59, %s2791_s28 }
0x14cc   :  { %v2680_v61 = vpop.eup %2679 }
0x14cd   :  { %1690 = vrot.lane.b32.xlu0 %v2680_v61, %s2791_s28 }
0x1538   :  { %v1796_v62 = vpop.permute.xlu1 %1795 }
0x1539   :  { %v1798_v63 = vmul.f32 %v2674_v53, %v1796_v62 }
0x153b   :  { %1800 = vrot.lane.b32.xlu0 %v1798_v63, %s2792_s29 }
0x153f   :  { %v1691_v2 = vpop.permute.xlu0 %1690 }
0x1540   :  { %v1693_v4 = vmul.f32 %v2676_v55, %v1691_v2 }
0x1542   :  { %1803 = vrot.lane.b32.xlu1 %v1693_v4, %s2791_s28 }
0x15ad   :  { %v1801_v7 = vpop.permute.xlu0 %1800 }
0x15b4   :  { %v1804_v1 = vpop.permute.xlu1 %1803 }
0x15b5   :  { %v1806_v8 = vsel %vm227_vm2, %v1801_v7, %v1804_v1 }
0x15b6   :  { %2530 = vmatmul.mubr.msk.f32.vlgmr.msra.gmra.mxu1 %vm337_vm3, %v1806_v8 }
0x1676   :  { %v1876_v3 = vpop.f32.mrf.mxu1 }
0x1677   :  { %v1877_v6 = vadd.f32 %v2718_v5, %v1876_v3 }
0x1678   :  { %v2531_v11 = vpop.f32.mrf.mxu1 }
0x1679   :  { %2681 = vtanh.f32 %v1877_v6  ;;  %v2132_v13 = vmul.f32 -1.442695, %v1877_v6 }
0x167b   :  { %2683 = vpow2.f32 %v2132_v13 }
0x1686   :  { %v2682_v12 = vpop.eup %2681 }
0x1687   :  { %1889 = vrot.lane.b32.xlu0 %v2682_v12, %s2791_s28 }
0x1688   :  { %v2684_v47 = vpop.eup %2683 }
0x1689   :  { %v1883_v14 = vadd.f32 1.0, %v2684_v47 }
0x168b   :  { %2685 = vrcp.f32 %v1883_v14 }
0x1698   :  { %v2686_v15 = vpop.eup %2685 }
0x1699   :  { %v1887_v20 = vmul.f32 %v2686_v15, %v1687_v51 }
0x16f9   :  { %v1890_v16 = vpop.permute.xlu0 %1889 }
0x16fa   :  { %v1892_v19 = vmul.f32 %v2686_v15, %v1890_v16 }
0x16fc   :  { %1894 = vrot.lane.b32.xlu1 %v1892_v19, %s2792_s29 }
0x1700   :  { %436 = vrot.lane.b32.xlu1 %v3021_v27, %s2792_s29 }
0x1704   :  { %855 = vrot.lane.b32.xlu1 %v3128_v9, %s2792_s29  ;;  %v1920_v9 = vld [vmem:[%s3398_s6 + $0x10] sm:$0xff] }
0x1705   :  { %2534 = vmatprep.subr.mxu0 %v1920_v9 }
0x1706   :  { %2535 = vmatpush3.msra.mxu0 %v1920_v9 }
0x1708   :  { %1275 = vrot.lane.b32.xlu1 %v3234_v42, %s2792_s29  ;;  %v1919_v42 = vld [vmem:[%s3398_s6 + $0x8] sm:$0xff] }
0x1709   :  { %2536 = vmatprep.subr.mxu0 %v1919_v42 }
0x170a   :  { %2537 = vmatpush3.msra.mxu0 %v1919_v42 }
0x170b   :  { %2538 = vmatprep.subr.mxu0 %v1918_v28 }
0x170c   :  { %1695 = vrot.lane.b32.xlu1 %v1693_v4, %s2792_s29  ;;  %2539 = vmatpush3.msra.mxu0 %v1918_v28 }
0x176e   :  { %v1895_v21 = vpop.permute.xlu1 %1894 }
0x176f   :  { %v1897_v22 = vadd.f32 %v1895_v21, %v1887_v20 }
0x1771   :  { %2687 = vtanh.f32 %v1897_v22 }
0x1772   :  { %v437_v23 = vpop.permute.xlu1 %436 }
0x1773   :  { %439 = vst.msk [vmem:[#allocation3] sm:$0xff] %vm227_vm2, %v437_v23 }
0x1776   :  { %v856_v27 = vpop.permute.xlu1 %855 }
0x1777   :  { %859 = vst.msk [vmem:[#allocation3 + $0x10] sm:$0xff] %vm227_vm2, %v856_v27 }
0x177a   :  { %v1276_v25 = vpop.permute.xlu1 %1275  ;;  %v1910_v48 = vld [vmem:[#allocation3] sm:$0xff] }
0x177b   :  { %1279 = vst.msk [vmem:[#allocation3 + $0x20] sm:$0xff] %vm227_vm2, %v1276_v25  ;;  %2540 = vmatprep.mubr.msk.f32.mxu0 %vm227_vm2, %v1910_v48 }
0x177e   :  { %v2688_v30 = vpop.eup %2687  ;;  %v1696_v32 = vpop.permute.xlu1 %1695 }
0x177f   :  { %1699 = vst.msk [vmem:[#allocation3 + $0x30] sm:$0xff] %vm227_vm2, %v1696_v32  ;;  %1900 = vrot.lane.b32.xlu0 %v2688_v30, %s2791_s28  ;;  %s2759_s28 = scalar_lea.vmem %s2080_s27, 1024 }
0x1780   :  { %p2760_p10 = scmp.ne.s32.totalorder %s2080_s27, %s2759_s28  ;;  %p2765_p12 = scmp.lt.s32.totalorder %s2759_s28, %s2759_s28 }
0x1782   :  { %p2766_p13 = por %p2765_p12, %p2764_p11 }
0x1783   :  { %645 = vrot.lane.b32.xlu0 %v3075_v18, %s2792_s29  ;;  %v1912_v18 = vld [vmem:[#allocation3 + $0x10] sm:$0xff] }
0x1784   :  { %p2767_p0 = pnand %p2766_p13, %p2760_p10 }
0x1786   :  { %v1916_v50 = vld [vmem:[#allocation3 + $0x30] sm:$0xff] }
0x1787   :  { %1065 = vrot.lane.b32.xlu0 %v3181_v60, %s2792_s29 }
0x178b   :  { %1485 = vrot.lane.b32.xlu0 %v3294_v17, %s2792_s29  ;;  %v1914_v17 = vld [vmem:[#allocation3 + $0x20] sm:$0xff] }
0x17f1   :  { %v1901_v34 = vpop.permute.xlu0 %1900 }
0x17f2   :  { %v1903_v36 = vmul.f32 %v2686_v15, %v1901_v34 }
0x17f4   :  { %1905 = vrot.lane.b32.xlu0 %v1903_v36, %s2792_s29 }
0x17f5   :  { %v646_v38 = vpop.permute.xlu0 %645 }
0x17f6   :  { %649 = vst.msk [vmem:[#allocation3 + $0x8] sm:$0xff] %vm227_vm2, %v646_v38 }
0x17f9   :  { %v1066_v41 = vpop.permute.xlu0 %1065 }
0x17fa   :  { %1069 = vst.msk [vmem:[#allocation3 + $0x18] sm:$0xff] %vm227_vm2, %v1066_v41 }
0x17fd   :  { %v1486_v45 = vpop.permute.xlu0 %1485  ;;  %v1911_v43 = vld [vmem:[#allocation3 + $0x8] sm:$0xff] }
0x17fe   :  { %1489 = vst.msk [vmem:[#allocation3 + $0x28] sm:$0xff] %vm227_vm2, %v1486_v45  ;;  %2541 = vmatmul.mubr.msk.f32.vlgmr.msra.gmra.mxu0 %vm227_vm2, %v1911_v43 }
0x17ff   :  { %2543 = vmatprep.mubr.msk.f32.mxu0 %vm227_vm2, %v1912_v18 }
0x1801   :  { %v1913_v60 = vld [vmem:[#allocation3 + $0x18] sm:$0xff] }
0x1802   :  { %2544 = vmatmul.mubr.msk.f32.gmra.mxu0 %vm227_vm2, %v1913_v60 }
0x1803   :  { %2546 = vmatprep.mubr.msk.f32.mxu0 %vm227_vm2, %v1914_v17 }
0x1805   :  { %v1915_v44 = vld [vmem:[#allocation3 + $0x28] sm:$0xff] }
0x1806   :  { %2547 = vmatmul.mubr.msk.f32.gmra.mxu0 %vm227_vm2, %v1915_v44 }
0x1807   :  { %2549 = vmatprep.mubr.msk.f32.mxu0 %vm227_vm2, %v1916_v50 }
0x1866   :  { %v1906_v26 = vpop.permute.xlu0 %1905 }
0x1867   :  { %1909 = vst.msk [vmem:[#allocation3 + $0x38] sm:$0xff] %vm227_vm2, %v1906_v26 }
0x186e   :  { %v1917_v0 = vld [vmem:[#allocation3 + $0x38] sm:$0xff] }
0x186f   :  { %2550 = vmatmul.mubr.msk.f32.gmra.mxu0 %vm227_vm2, %v1917_v0 }
0x18be   :  { %v2542_v31 = vpop.f32.mrf.mxu0 }
0x18bf   :  { %v2025_v49 = vadd.f32 %v2542_v31, %v2133_v29 }
0x18c0   :  { %v2019_v33 = vpop.f32.mrf.mxu0 }
0x18c1   :  { %2689 = vtanh.f32 %v2025_v49  ;;  %v2020_v35 = vadd.f32 %v2133_v29, %v2019_v33 }
0x18c2   :  { %v2545_v37 = vpop.f32.mrf.mxu0 }
0x18c3   :  { %2691 = vtanh.f32 %v2020_v35  ;;  %v2035_v53 = vadd.f32 %v2545_v37, %v2133_v29 }
0x18c4   :  { %v2029_v52 = vpop.f32.mrf.mxu0 }
0x18c5   :  { %2693 = vtanh.f32 %v2035_v53  ;;  %v2030_v54 = vadd.f32 %v2133_v29, %v2029_v52 }
0x18c6   :  { %v2548_v55 = vpop.f32.mrf.mxu0 }
0x18c7   :  { %2695 = vtanh.f32 %v2030_v54  ;;  %v2045_v46 = vadd.f32 %v2548_v55, %v2133_v29 }
0x18c8   :  { %v2039_v56 = vpop.f32.mrf.mxu0 }
0x18c9   :  { %2697 = vtanh.f32 %v2045_v46  ;;  %v2040_v57 = vadd.f32 %v2133_v29, %v2039_v56 }
0x18cb   :  { %2699 = vtanh.f32 %v2040_v57 }
0x18ce   :  { %v2690_v39 = vpop.eup %2689 }
0x18cf   :  { %2067 = vst.msk [vmem:[#allocation9 + $0x8] sm:$0xff] %vm75_vm1, %v2690_v39 }
0x18d0   :  { %v2692_v58 = vpop.eup %2691 }
0x18d1   :  { %2066 = vst.msk [vmem:[#allocation9] sm:$0xff] %vm75_vm1, %v2692_v58 }
0x18d2   :  { %v2694_v40 = vpop.eup %2693 }
0x18d3   :  { %2069 = vst.msk [vmem:[#allocation9 + $0x18] sm:$0xff] %vm75_vm1, %v2694_v40 }
0x18d4   :  { %v2696_v10 = vpop.eup %2695 }
0x18d5   :  { %2068 = vst.msk [vmem:[#allocation9 + $0x10] sm:$0xff] %vm75_vm1, %v2696_v10 }
0x18d6   :  { %v2698_v51 = vpop.eup %2697 }
0x18d7   :  { %2071 = vst.msk [vmem:[#allocation9 + $0x28] sm:$0xff] %vm75_vm1, %v2698_v51 }
0x18d8   :  { %v2700_v59 = vpop.eup %2699 }
0x18d9   :  { %2070 = vst.msk [vmem:[#allocation9 + $0x20] sm:$0xff] %vm75_vm1, %v2700_v59 }
0x192f   :  { %v2551_v61 = vpop.f32.mrf.mxu0 }
0x1930   :  { %v2055_v62 = vadd.f32 %v2551_v61, %v2133_v29 }
0x1931   :  { %v2049_v63 = vpop.f32.mrf.mxu0 }
0x1932   :  { %2701 = vtanh.f32 %v2055_v62  ;;  %v2050_v2 = vadd.f32 %v2133_v29, %v2049_v63 }
0x1934   :  { %2703 = vtanh.f32 %v2050_v2 }
0x193f   :  { %v2702_v4 = vpop.eup %2701 }
0x1940   :  { %2073 = vst.msk [vmem:[#allocation9 + $0x38] sm:$0xff] %vm75_vm1, %v2702_v4 }
0x1941   :  { %v2704_v7 = vpop.eup %2703 }
0x1942   :  { %2072 = vst.msk [vmem:[#allocation9 + $0x30] sm:$0xff] %vm75_vm1, %v2704_v7 }
0x1943   :  { %2770 = shalt.err (!%p2767_p0)
}
0x1944   :  { %2085 = dma.vmem_to_hbm [thread:$0]  %s2080_s27, 1024, %s3400_s8, [#allocation6], %s2786_s30, %s2786_s30, %s2787_s9  }
0x1945   :  { %2783 = dma.done.wait [#allocation6], 1024  }
0x1946   :  { %2784 = vsyncadd [#allocation6], 4294966272 }
0x1947   :  { %2089 = vsyncpa [#allocation5], 1 }
0x1948   :  { %2090 = vsyncpa [#allocation8], 1 }
0x1949   :  { %2091 = vsyncpa [#allocation6], 1 }

</bundles_post_ra>
